<compile_context>
chip_gen: v7x
topology: tpu7x:2x2x1
jax: 0.10.0
libtpu: 0.0.40
codegen_flags: <defaults>
</compile_context>

<pallas_src>
import functools
import math

import jax
import jax.numpy as jnp
from jax.experimental import pallas as pl
from jax.experimental.pallas import tpu as pltpu


def _mha_kernel(q_ref, k_ref, v_ref,
                wq_ref, bq_ref, wk_ref, bk_ref, wv_ref, bv_ref,
                wfc_ref, bfc_ref, gamma_ref, beta_ref,
                out_ref, attn_ref,
                *, heads, d_k, d_v, eps):
    bf16 = jnp.bfloat16

    q = q_ref[0]          # (L, D) f32 (kept f32 for the residual / LayerNorm)
    k = k_ref[0]          # (T, D)
    v = v_ref[0]          # (T, D)
    L = q.shape[0]
    T = k.shape[0]

    # Projections: weights arrive pre-transposed (D, H*dk) in bf16, so each is
    # a single MXU matmul with f32 accumulation and no in-kernel transpose.
    qp = jnp.dot(q.astype(bf16), wq_ref[...],
                 preferred_element_type=jnp.float32) + bq_ref[...]   # (L, H*dk)
    kp = jnp.dot(k.astype(bf16), wk_ref[...],
                 preferred_element_type=jnp.float32) + bk_ref[...]   # (T, H*dk)
    vp = jnp.dot(v.astype(bf16), wv_ref[...],
                 preferred_element_type=jnp.float32) + bv_ref[...]   # (T, H*dv)

    # TODO(synk): reference divides by `np.sort(q.shape[-1])` (a typo that would
    # error at runtime); standard 1/sqrt(d_k) scaling is used instead.
    scale = 1.0 / math.sqrt(d_k)

    # Split heads once (small f32 relayout), then batched contractions over all
    # heads at once instead of a per-head Python loop + concatenate.
    qh = jnp.transpose(qp.reshape(L, heads, d_k), (1, 0, 2)).astype(bf16)  # (H, L, dk)
    kh = jnp.transpose(kp.reshape(T, heads, d_k), (1, 0, 2)).astype(bf16)  # (H, T, dk)
    vh = jnp.transpose(vp.reshape(T, heads, d_v), (1, 0, 2)).astype(bf16)  # (H, T, dv)

    s = jnp.einsum('hlk,htk->hlt', qh, kh,
                   preferred_element_type=jnp.float32) * scale             # (H, L, T)

    # Softmax over keys (f32 statistics, EUP reciprocal).
    s = s - jnp.max(s, axis=-1, keepdims=True)
    p = jnp.exp(s)
    p = p * pl.reciprocal(jnp.sum(p, axis=-1, keepdims=True), approx=True)

    attn_ref[0] = p                                                         # (H, L, T)

    # All-head PV product in one batched contraction; dropout p=0.0 -> identity.
    o = jnp.einsum('hlt,htv->hlv', p.astype(bf16), vh,
                   preferred_element_type=jnp.float32)                      # (H, L, dv)
    cat = jnp.transpose(o, (1, 0, 2)).reshape(L, heads * d_v)               # (L, H*dv)

    # Output projection + residual.
    y = jnp.dot(cat.astype(bf16), wfc_ref[...],
                preferred_element_type=jnp.float32) + bfc_ref[...]
    y = y + q

    # LayerNorm over d_model (f32, biased variance, matches nn.LayerNorm).
    mean = jnp.mean(y, axis=-1, keepdims=True)
    var = jnp.mean((y - mean) ** 2, axis=-1, keepdims=True)
    norm = (y - mean) * jax.lax.rsqrt(var + eps)
    out_ref[0] = norm * gamma_ref[...] + beta_ref[...]


def mha_forward(q, k, v, params, *, heads, d_k, d_v, eps=1e-5):
    B, L, D = q.shape
    T = k.shape[1]
    wq, bq, wk, bk, wv, bv, wfc, bfc, gamma, beta = params

    # Pre-transpose + downcast the matmul weights once in the wrapper so the
    # kernel never transposes and the MXU consumes bf16 operands (f32 accum).
    bf16 = jnp.bfloat16
    wq_t = wq.T.astype(bf16)       # (D, H*dk)
    wk_t = wk.T.astype(bf16)       # (D, H*dk)
    wv_t = wv.T.astype(bf16)       # (D, H*dv)
    wfc_t = wfc.T.astype(bf16)     # (H*dv, D)

    kernel = functools.partial(_mha_kernel, heads=heads, d_k=d_k, d_v=d_v, eps=eps)

    def full_spec(arr):
        nd = arr.ndim
        return pl.BlockSpec(arr.shape, lambda i, _nd=nd: (0,) * _nd)

    out, attn_bhlt = pl.pallas_call(
        kernel,
        out_shape=(
            jax.ShapeDtypeStruct((B, L, D), jnp.float32),
            jax.ShapeDtypeStruct((B, heads, L, T), jnp.float32),
        ),
        grid=(B,),
        in_specs=[
            pl.BlockSpec((1, L, D), lambda i: (i, 0, 0)),   # q
            pl.BlockSpec((1, T, D), lambda i: (i, 0, 0)),   # k
            pl.BlockSpec((1, T, D), lambda i: (i, 0, 0)),   # v
            full_spec(wq_t), full_spec(bq),
            full_spec(wk_t), full_spec(bk),
            full_spec(wv_t), full_spec(bv),
            full_spec(wfc_t), full_spec(bfc),
            full_spec(gamma), full_spec(beta),
        ],
        out_specs=(
            pl.BlockSpec((1, L, D), lambda i: (i, 0, 0)),
            # Batch-major attn: one contiguous slab written per grid step.
            pl.BlockSpec((1, heads, L, T), lambda i: (i, 0, 0, 0)),
        ),
        # Batch iterations are independent -> shard across TensorCores (v7x).
        compiler_params=pltpu.CompilerParams(dimension_semantics=("parallel",)),
    )(q, k, v, wq_t, bq, wk_t, bk, wv_t, bv, wfc_t, bfc, gamma, beta)

    # Match the module's 'h b l t' attention layout (cheap XLA transpose).
    attn = jnp.transpose(attn_bhlt, (1, 0, 2, 3))
    return out, attn


def mha_reference(q, k, v, params, *, heads, d_k, d_v, eps=1e-5):
    """Pure-JAX (f32) reference for correctness checking."""
    wq, bq, wk, bk, wv, bv, wfc, bfc, gamma, beta = params
    B, L, D = q.shape
    T = k.shape[1]

    qp = (q @ wq.T + bq).reshape(B, L, heads, d_k).transpose(2, 0, 1, 3)   # h b l k
    kp = (k @ wk.T + bk).reshape(B, T, heads, d_k).transpose(2, 0, 1, 3)   # h b t k
    vp = (v @ wv.T + bv).reshape(B, T, heads, d_v).transpose(2, 0, 1, 3)   # h b t v

    scale = 1.0 / math.sqrt(d_k)
    attn = jnp.einsum('hblk,hbtk->hblt', qp, kp) * scale
    attn = jax.nn.softmax(attn, axis=-1)
    out = jnp.einsum('hblt,hbtv->hblv', attn, vp)
    out = out.transpose(1, 2, 0, 3).reshape(B, L, heads * d_v)

    y = out @ wfc.T + bfc + q
    mean = jnp.mean(y, axis=-1, keepdims=True)
    var = jnp.mean((y - mean) ** 2, axis=-1, keepdims=True)
    y = (y - mean) * jax.lax.rsqrt(var + eps)
    y = y * gamma + beta
    return y, attn


def init_params(key, heads, d_model, d_k, d_v):
    ks = jax.random.split(key, 8)
    s = 0.02
    wq = s * jax.random.normal(ks[0], (heads * d_k, d_model), jnp.float32)
    bq = s * jax.random.normal(ks[1], (1, heads * d_k), jnp.float32)
    wk = s * jax.random.normal(ks[2], (heads * d_k, d_model), jnp.float32)
    bk = s * jax.random.normal(ks[3], (1, heads * d_k), jnp.float32)
    wv = s * jax.random.normal(ks[4], (heads * d_v, d_model), jnp.float32)
    bv = s * jax.random.normal(ks[5], (1, heads * d_v), jnp.float32)
    wfc = s * jax.random.normal(ks[6], (d_model, heads * d_v), jnp.float32)
    bfc = s * jax.random.normal(ks[7], (1, d_model), jnp.float32)
    gamma = jnp.ones((1, d_model), jnp.float32)     # nn.LayerNorm default init
    beta = jnp.zeros((1, d_model), jnp.float32)
    return (wq, bq, wk, bk, wv, bv, wfc, bfc, gamma, beta)


if __name__ == "__main__":
    heads, d_model, d_k, d_v = 4, 32, 8, 8
    B, L, T = 2, 8, 16

    key = jax.random.PRNGKey(0)
    kq, kk, kv, kp = jax.random.split(key, 4)
    q = jax.random.normal(kq, (B, L, d_model), jnp.float32)
    k = jax.random.normal(kk, (B, T, d_model), jnp.float32)
    v = jax.random.normal(kv, (B, T, d_model), jnp.float32)
    params = init_params(kp, heads, d_model, d_k, d_v)

    out, attn = mha_forward(q, k, v, params, heads=heads, d_k=d_k, d_v=d_v)
    out = jax.block_until_ready(out)
    attn = jax.block_until_ready(attn)

    out_ref, attn_ref = mha_reference(q, k, v, params, heads=heads, d_k=d_k, d_v=d_v)
    assert out.shape == (B, L, d_model) and attn.shape == (heads, B, L, T)
    # Tolerances account for bf16 MXU operands (f32 accumulation) and the
    # approximate EUP reciprocal in the softmax.
    assert jnp.allclose(out, out_ref, atol=5e-3), "output mismatch"
    assert jnp.allclose(attn, attn_ref, atol=2e-3), "attention mismatch"

    print("KERNEL_OK")
</pallas_src>

<mosaic_0001>
module attributes {stable_mosaic.version = 11 : i64} {
  func.func @_mha_kernel(%arg0: i32, %arg1: memref<1x8x32xf32, #tpu.memory_space<vmem>>, %arg2: memref<1x16x32xf32, #tpu.memory_space<vmem>>, %arg3: memref<1x16x32xf32, #tpu.memory_space<vmem>>, %arg4: memref<32x32xbf16, #tpu.memory_space<vmem>>, %arg5: memref<1x32xf32, #tpu.memory_space<vmem>>, %arg6: memref<32x32xbf16, #tpu.memory_space<vmem>>, %arg7: memref<1x32xf32, #tpu.memory_space<vmem>>, %arg8: memref<32x32xbf16, #tpu.memory_space<vmem>>, %arg9: memref<1x32xf32, #tpu.memory_space<vmem>>, %arg10: memref<32x32xbf16, #tpu.memory_space<vmem>>, %arg11: memref<1x32xf32, #tpu.memory_space<vmem>>, %arg12: memref<1x32xf32, #tpu.memory_space<vmem>>, %arg13: memref<1x32xf32, #tpu.memory_space<vmem>>, %arg14: memref<1x8x32xf32, #tpu.memory_space<vmem>>, %arg15: memref<1x4x8x16xf32, #tpu.memory_space<vmem>>) attributes {dimension_semantics = [#tpu.dimension_semantics<parallel>], iteration_bounds = array<i64: 2>, scalar_prefetch = 0 : i64, scratch_operands = 0 : i64, tpu.core_type = #tpu.core_type<tc>, window_params = [{transform_indices = @transform_0, window_bounds = array<i64: 1, 8, 32>}, {transform_indices = @transform_1, window_bounds = array<i64: 1, 16, 32>}, {transform_indices = @transform_2, window_bounds = array<i64: 1, 16, 32>}, {pipeline_mode = #tpu.pipeline_mode<synchronous>, transform_indices = @transform_3, window_bounds = array<i64: 32, 32>}, {pipeline_mode = #tpu.pipeline_mode<synchronous>, transform_indices = @transform_4, window_bounds = array<i64: 1, 32>}, {pipeline_mode = #tpu.pipeline_mode<synchronous>, transform_indices = @transform_5, window_bounds = array<i64: 32, 32>}, {pipeline_mode = #tpu.pipeline_mode<synchronous>, transform_indices = @transform_6, window_bounds = array<i64: 1, 32>}, {pipeline_mode = #tpu.pipeline_mode<synchronous>, transform_indices = @transform_7, window_bounds = array<i64: 32, 32>}, {pipeline_mode = #tpu.pipeline_mode<synchronous>, transform_indices = @transform_8, window_bounds = array<i64: 1, 32>}, {pipeline_mode = #tpu.pipeline_mode<synchronous>, transform_indices = @transform_9, window_bounds = array<i64: 32, 32>}, {pipeline_mode = #tpu.pipeline_mode<synchronous>, transform_indices = @transform_10, window_bounds = array<i64: 1, 32>}, {pipeline_mode = #tpu.pipeline_mode<synchronous>, transform_indices = @transform_11, window_bounds = array<i64: 1, 32>}, {pipeline_mode = #tpu.pipeline_mode<synchronous>, transform_indices = @transform_12, window_bounds = array<i64: 1, 32>}, {transform_indices = @transform_13, window_bounds = array<i64: 1, 8, 32>}, {transform_indices = @transform_14, window_bounds = array<i64: 1, 4, 8, 16>}]} {
    %c0 = arith.constant 0 : index
    %c0_0 = arith.constant 0 : index
    %c0_1 = arith.constant 0 : index
    %0 = vector.load %arg1[%c0, %c0_0, %c0_1] : memref<1x8x32xf32, #tpu.memory_space<vmem>>, vector<1x8x32xf32>
    %1 = vector.shape_cast %0 : vector<1x8x32xf32> to vector<8x32xf32>
    %c0_2 = arith.constant 0 : index
    %c0_3 = arith.constant 0 : index
    %c0_4 = arith.constant 0 : index
    %2 = vector.load %arg2[%c0_2, %c0_3, %c0_4] : memref<1x16x32xf32, #tpu.memory_space<vmem>>, vector<1x16x32xf32>
    %3 = vector.shape_cast %2 : vector<1x16x32xf32> to vector<16x32xf32>
    %c0_5 = arith.constant 0 : index
    %c0_6 = arith.constant 0 : index
    %c0_7 = arith.constant 0 : index
    %4 = vector.load %arg3[%c0_5, %c0_6, %c0_7] : memref<1x16x32xf32, #tpu.memory_space<vmem>>, vector<1x16x32xf32>
    %5 = vector.shape_cast %4 : vector<1x16x32xf32> to vector<16x32xf32>
    %6 = arith.truncf %1 : vector<8x32xf32> to vector<8x32xbf16>
    %c0_8 = arith.constant 0 : index
    %c0_9 = arith.constant 0 : index
    %7 = vector.load %arg4[%c0_8, %c0_9] : memref<32x32xbf16, #tpu.memory_space<vmem>>, vector<32x32xbf16>
    %cst = arith.constant dense<0.000000e+00> : vector<8x32xf32>
    %8 = tpu.matmul %6, %7, %cst {dimension_numbers = #tpu.dot_dimension_numbers<[1], [0], [0], [1], [0, 0, 1, 1], [], []>} : vector<8x32xbf16>, vector<32x32xbf16>, vector<8x32xf32> -> vector<8x32xf32>
    %c0_10 = arith.constant 0 : index
    %c0_11 = arith.constant 0 : index
    %9 = vector.load %arg5[%c0_10, %c0_11] : memref<1x32xf32, #tpu.memory_space<vmem>>, vector<1x32xf32>
    %10 = vector.broadcast %9 : vector<1x32xf32> to vector<8x32xf32>
    %11 = arith.addf %8, %10 : vector<8x32xf32>
    %12 = arith.truncf %3 : vector<16x32xf32> to vector<16x32xbf16>
    %c0_12 = arith.constant 0 : index
    %c0_13 = arith.constant 0 : index
    %13 = vector.load %arg6[%c0_12, %c0_13] : memref<32x32xbf16, #tpu.memory_space<vmem>>, vector<32x32xbf16>
    %cst_14 = arith.constant dense<0.000000e+00> : vector<16x32xf32>
    %14 = tpu.matmul %12, %13, %cst_14 {dimension_numbers = #tpu.dot_dimension_numbers<[1], [0], [0], [1], [0, 0, 1, 1], [], []>} : vector<16x32xbf16>, vector<32x32xbf16>, vector<16x32xf32> -> vector<16x32xf32>
    %c0_15 = arith.constant 0 : index
    %c0_16 = arith.constant 0 : index
    %15 = vector.load %arg7[%c0_15, %c0_16] : memref<1x32xf32, #tpu.memory_space<vmem>>, vector<1x32xf32>
    %16 = vector.broadcast %15 : vector<1x32xf32> to vector<16x32xf32>
    %17 = arith.addf %14, %16 : vector<16x32xf32>
    %18 = arith.truncf %5 : vector<16x32xf32> to vector<16x32xbf16>
    %c0_17 = arith.constant 0 : index
    %c0_18 = arith.constant 0 : index
    %19 = vector.load %arg8[%c0_17, %c0_18] : memref<32x32xbf16, #tpu.memory_space<vmem>>, vector<32x32xbf16>
    %cst_19 = arith.constant dense<0.000000e+00> : vector<16x32xf32>
    %20 = tpu.matmul %18, %19, %cst_19 {dimension_numbers = #tpu.dot_dimension_numbers<[1], [0], [0], [1], [0, 0, 1, 1], [], []>} : vector<16x32xbf16>, vector<32x32xbf16>, vector<16x32xf32> -> vector<16x32xf32>
    %c0_20 = arith.constant 0 : index
    %c0_21 = arith.constant 0 : index
    %21 = vector.load %arg9[%c0_20, %c0_21] : memref<1x32xf32, #tpu.memory_space<vmem>>, vector<1x32xf32>
    %22 = vector.broadcast %21 : vector<1x32xf32> to vector<16x32xf32>
    %23 = arith.addf %20, %22 : vector<16x32xf32>
    %24 = vector.shape_cast %11 : vector<8x32xf32> to vector<8x4x8xf32>
    %25 = tpu.transpose %24, [1, 0, 2] : vector<8x4x8xf32> -> vector<4x8x8xf32>
    %26 = arith.truncf %25 : vector<4x8x8xf32> to vector<4x8x8xbf16>
    %27 = vector.shape_cast %17 : vector<16x32xf32> to vector<16x4x8xf32>
    %28 = tpu.transpose %27, [1, 0, 2] : vector<16x4x8xf32> -> vector<4x16x8xf32>
    %29 = arith.truncf %28 : vector<4x16x8xf32> to vector<4x16x8xbf16>
    %30 = vector.shape_cast %23 : vector<16x32xf32> to vector<16x4x8xf32>
    %31 = tpu.transpose %30, [1, 0, 2] : vector<16x4x8xf32> -> vector<4x16x8xf32>
    %32 = arith.truncf %31 : vector<4x16x8xf32> to vector<4x16x8xbf16>
    "tpu.trace_start"() <{level = 10 : i32, message = "hlk,htk->hlt"}> : () -> ()
    %cst_22 = arith.constant dense<0.000000e+00> : vector<4x8x16xf32>
    %33 = tpu.matmul %26, %29, %cst_22 {dimension_numbers = #tpu.dot_dimension_numbers<[2], [2], [1], [1], [0, 0, 0, 1, 1, 1], [0], [0]>} : vector<4x8x8xbf16>, vector<4x16x8xbf16>, vector<4x8x16xf32> -> vector<4x8x16xf32>
    "tpu.trace_stop"() : () -> ()
    %cst_23 = arith.constant 0.353553385 : f32
    %34 = vector.broadcast %cst_23 : f32 to vector<4x8x16xf32>
    %35 = arith.mulf %33, %34 : vector<4x8x16xf32>
    %cst_24 = arith.constant dense<0xFF800000> : vector<4x8xf32>
    %36 = vector.multi_reduction <maximumf>, %35, %cst_24 [2] : vector<4x8x16xf32> to vector<4x8xf32>
    %37 = vector.shape_cast %36 : vector<4x8xf32> to vector<4x8x1xf32>
    %38 = vector.broadcast %37 : vector<4x8x1xf32> to vector<4x8x16xf32>
    %39 = arith.subf %35, %38 : vector<4x8x16xf32>
    %40 = math.exp %39 : vector<4x8x16xf32>
    %cst_25 = arith.constant dense<0.000000e+00> : vector<4x8xf32>
    %41 = vector.multi_reduction <add>, %40, %cst_25 [2] : vector<4x8x16xf32> to vector<4x8xf32>
    %42 = vector.shape_cast %41 : vector<4x8xf32> to vector<4x8x1xf32>
    %43 = tpu.reciprocal %42 {approx = true} : vector<4x8x1xf32> -> vector<4x8x1xf32>
    %44 = vector.broadcast %43 : vector<4x8x1xf32> to vector<4x8x16xf32>
    %45 = arith.mulf %40, %44 : vector<4x8x16xf32>
    %c0_26 = arith.constant 0 : index
    %c0_27 = arith.constant 0 : index
    %c0_28 = arith.constant 0 : index
    %c0_29 = arith.constant 0 : index
    %46 = vector.load %arg15[%c0_26, %c0_27, %c0_28, %c0_29] : memref<1x4x8x16xf32, #tpu.memory_space<vmem>>, vector<1x4x8x16xf32>
    %47 = vector.shape_cast %46 : vector<1x4x8x16xf32> to vector<4x8x16xf32>
    %48 = vector.shape_cast %45 : vector<4x8x16xf32> to vector<1x4x8x16xf32>
    tpu.vector_store %arg15[%c0_26, %c0_27, %c0_28, %c0_29], %48 {strides = array<i32>} : memref<1x4x8x16xf32, #tpu.memory_space<vmem>>, vector<1x4x8x16xf32>,
    %49 = arith.truncf %45 : vector<4x8x16xf32> to vector<4x8x16xbf16>
    "tpu.trace_start"() <{level = 10 : i32, message = "hlt,htv->hlv"}> : () -> ()
    %cst_30 = arith.constant dense<0.000000e+00> : vector<4x8x8xf32>
    %50 = tpu.matmul %49, %32, %cst_30 {dimension_numbers = #tpu.dot_dimension_numbers<[2], [1], [1], [2], [0, 0, 0, 1, 1, 2], [0], [0]>} : vector<4x8x16xbf16>, vector<4x16x8xbf16>, vector<4x8x8xf32> -> vector<4x8x8xf32>
    "tpu.trace_stop"() : () -> ()
    %51 = tpu.transpose %50, [1, 0, 2] : vector<4x8x8xf32> -> vector<8x4x8xf32>
    %52 = vector.shape_cast %51 : vector<8x4x8xf32> to vector<8x32xf32>
    %53 = arith.truncf %52 : vector<8x32xf32> to vector<8x32xbf16>
    %c0_31 = arith.constant 0 : index
    %c0_32 = arith.constant 0 : index
    %54 = vector.load %arg10[%c0_31, %c0_32] : memref<32x32xbf16, #tpu.memory_space<vmem>>, vector<32x32xbf16>
    %cst_33 = arith.constant dense<0.000000e+00> : vector<8x32xf32>
    %55 = tpu.matmul %53, %54, %cst_33 {dimension_numbers = #tpu.dot_dimension_numbers<[1], [0], [0], [1], [0, 0, 1, 1], [], []>} : vector<8x32xbf16>, vector<32x32xbf16>, vector<8x32xf32> -> vector<8x32xf32>
    %c0_34 = arith.constant 0 : index
    %c0_35 = arith.constant 0 : index
    %56 = vector.load %arg11[%c0_34, %c0_35] : memref<1x32xf32, #tpu.memory_space<vmem>>, vector<1x32xf32>
    %57 = vector.broadcast %56 : vector<1x32xf32> to vector<8x32xf32>
    %58 = arith.addf %55, %57 : vector<8x32xf32>
    %59 = arith.addf %58, %1 : vector<8x32xf32>
    %cst_36 = arith.constant dense<0.000000e+00> : vector<8xf32>
    %60 = vector.multi_reduction <add>, %59, %cst_36 [1] : vector<8x32xf32> to vector<8xf32>
    %61 = vector.shape_cast %60 : vector<8xf32> to vector<8x1xf32>
    %cst_37 = arith.constant 3.200000e+01 : f32
    %62 = vector.broadcast %cst_37 : f32 to vector<8x1xf32>
    %63 = arith.divf %61, %62 : vector<8x1xf32>
    %64 = vector.broadcast %63 : vector<8x1xf32> to vector<8x32xf32>
    %65 = arith.subf %59, %64 : vector<8x32xf32>
    %66 = arith.mulf %65, %65 : vector<8x32xf32>
    %cst_38 = arith.constant dense<0.000000e+00> : vector<8xf32>
    %67 = vector.multi_reduction <add>, %66, %cst_38 [1] : vector<8x32xf32> to vector<8xf32>
    %68 = vector.shape_cast %67 : vector<8xf32> to vector<8x1xf32>
    %cst_39 = arith.constant 3.200000e+01 : f32
    %69 = vector.broadcast %cst_39 : f32 to vector<8x1xf32>
    %70 = arith.divf %68, %69 : vector<8x1xf32>
    %71 = vector.broadcast %63 : vector<8x1xf32> to vector<8x32xf32>
    %72 = arith.subf %59, %71 : vector<8x32xf32>
    %cst_40 = arith.constant 9.99999974E-6 : f32
    %73 = vector.broadcast %cst_40 : f32 to vector<8x1xf32>
    %74 = arith.addf %70, %73 : vector<8x1xf32>
    %75 = math.rsqrt %74 : vector<8x1xf32>
    %76 = vector.broadcast %75 : vector<8x1xf32> to vector<8x32xf32>
    %77 = arith.mulf %72, %76 : vector<8x32xf32>
    %c0_41 = arith.constant 0 : index
    %c0_42 = arith.constant 0 : index
    %78 = vector.load %arg12[%c0_41, %c0_42] : memref<1x32xf32, #tpu.memory_space<vmem>>, vector<1x32xf32>
    %79 = vector.broadcast %78 : vector<1x32xf32> to vector<8x32xf32>
    %80 = arith.mulf %77, %79 : vector<8x32xf32>
    %c0_43 = arith.constant 0 : index
    %c0_44 = arith.constant 0 : index
    %81 = vector.load %arg13[%c0_43, %c0_44] : memref<1x32xf32, #tpu.memory_space<vmem>>, vector<1x32xf32>
    %82 = vector.broadcast %81 : vector<1x32xf32> to vector<8x32xf32>
    %83 = arith.addf %80, %82 : vector<8x32xf32>
    %c0_45 = arith.constant 0 : index
    %c0_46 = arith.constant 0 : index
    %c0_47 = arith.constant 0 : index
    %84 = vector.load %arg14[%c0_45, %c0_46, %c0_47] : memref<1x8x32xf32, #tpu.memory_space<vmem>>, vector<1x8x32xf32>
    %85 = vector.shape_cast %84 : vector<1x8x32xf32> to vector<8x32xf32>
    %86 = vector.shape_cast %83 : vector<8x32xf32> to vector<1x8x32xf32>
    tpu.vector_store %arg14[%c0_45, %c0_46, %c0_47], %86 {strides = array<i32>} : memref<1x8x32xf32, #tpu.memory_space<vmem>>, vector<1x8x32xf32>,
    return
  }
  func.func @transform_0(%arg0: i32) -> (i32, i32, i32) {
    %c0_i32 = arith.constant 0 : i32
    %c0_i32_0 = arith.constant 0 : i32
    %c0_i32_1 = arith.constant 0 : i32
    return %arg0, %c0_i32, %c0_i32_0 : i32, i32, i32
  }
  func.func @transform_1(%arg0: i32) -> (i32, i32, i32) {
    %c0_i32 = arith.constant 0 : i32
    %c0_i32_0 = arith.constant 0 : i32
    %c0_i32_1 = arith.constant 0 : i32
    return %arg0, %c0_i32, %c0_i32_0 : i32, i32, i32
  }
  func.func @transform_2(%arg0: i32) -> (i32, i32, i32) {
    %c0_i32 = arith.constant 0 : i32
    %c0_i32_0 = arith.constant 0 : i32
    %c0_i32_1 = arith.constant 0 : i32
    return %arg0, %c0_i32, %c0_i32_0 : i32, i32, i32
  }
  func.func @transform_3(%arg0: i32) -> (i32, i32) {
    %c0_i32 = arith.constant 0 : i32
    %c0_i32_0 = arith.constant 0 : i32
    %c0_i32_1 = arith.constant 0 : i32
    return %c0_i32, %c0_i32_0 : i32, i32
  }
  func.func @transform_4(%arg0: i32) -> (i32, i32) {
    %c0_i32 = arith.constant 0 : i32
    %c0_i32_0 = arith.constant 0 : i32
    %c0_i32_1 = arith.constant 0 : i32
    return %c0_i32, %c0_i32_0 : i32, i32
  }
  func.func @transform_5(%arg0: i32) -> (i32, i32) {
    %c0_i32 = arith.constant 0 : i32
    %c0_i32_0 = arith.constant 0 : i32
    %c0_i32_1 = arith.constant 0 : i32
    return %c0_i32, %c0_i32_0 : i32, i32
  }
  func.func @transform_6(%arg0: i32) -> (i32, i32) {
    %c0_i32 = arith.constant 0 : i32
    %c0_i32_0 = arith.constant 0 : i32
    %c0_i32_1 = arith.constant 0 : i32
    return %c0_i32, %c0_i32_0 : i32, i32
  }
  func.func @transform_7(%arg0: i32) -> (i32, i32) {
    %c0_i32 = arith.constant 0 : i32
    %c0_i32_0 = arith.constant 0 : i32
    %c0_i32_1 = arith.constant 0 : i32
    return %c0_i32, %c0_i32_0 : i32, i32
  }
  func.func @transform_8(%arg0: i32) -> (i32, i32) {
    %c0_i32 = arith.constant 0 : i32
    %c0_i32_0 = arith.constant 0 : i32
    %c0_i32_1 = arith.constant 0 : i32
    return %c0_i32, %c0_i32_0 : i32, i32
  }
  func.func @transform_9(%arg0: i32) -> (i32, i32) {
    %c0_i32 = arith.constant 0 : i32
    %c0_i32_0 = arith.constant 0 : i32
    %c0_i32_1 = arith.constant 0 : i32
    return %c0_i32, %c0_i32_0 : i32, i32
  }
  func.func @transform_10(%arg0: i32) -> (i32, i32) {
    %c0_i32 = arith.constant 0 : i32
    %c0_i32_0 = arith.constant 0 : i32
    %c0_i32_1 = arith.constant 0 : i32
    return %c0_i32, %c0_i32_0 : i32, i32
  }
  func.func @transform_11(%arg0: i32) -> (i32, i32) {
    %c0_i32 = arith.constant 0 : i32
    %c0_i32_0 = arith.constant 0 : i32
    %c0_i32_1 = arith.constant 0 : i32
    return %c0_i32, %c0_i32_0 : i32, i32
  }
  func.func @transform_12(%arg0: i32) -> (i32, i32) {
    %c0_i32 = arith.constant 0 : i32
    %c0_i32_0 = arith.constant 0 : i32
    %c0_i32_1 = arith.constant 0 : i32
    return %c0_i32, %c0_i32_0 : i32, i32
  }
  func.func @transform_13(%arg0: i32) -> (i32, i32, i32) {
    %c0_i32 = arith.constant 0 : i32
    %c0_i32_0 = arith.constant 0 : i32
    %c0_i32_1 = arith.constant 0 : i32
    return %arg0, %c0_i32, %c0_i32_0 : i32, i32, i32
  }
  func.func @transform_14(%arg0: i32) -> (i32, i32, i32, i32) {
    %c0_i32 = arith.constant 0 : i32
    %c0_i32_0 = arith.constant 0 : i32
    %c0_i32_1 = arith.constant 0 : i32
    %c0_i32_2 = arith.constant 0 : i32
    return %arg0, %c0_i32, %c0_i32_0, %c0_i32_1 : i32, i32, i32, i32
  }
}

</mosaic_0001>

<bundles_post_ra>
// kernel: tpu_custom_call.1
= control target key start
LH: loop header
LB: loop body
LE: loop exit
PB: predicated region body
PF: predicated region fallthrough
CT: control target
= control target key end

     0   :  { %s3794_s0 = inlined_call_operand.hbm [shape: f32[2,8,32], index: 0, kind: input, shape index: {}]   ;;  %s3795_s1 = inlined_call_operand.hbm [shape: f32[2,16,32], index: 1, kind: input, shape index: {}]   ;;  %s3796_s2 = inlined_call_operand.hbm [shape: f32[2,16,32], index: 2, kind: input, shape index: {}]   ;;  %s3797_s3 = inlined_call_operand.hbm [shape: bf16[32,32], index: 3, kind: input, shape index: {}]   ;;  %s3798_s4 = inlined_call_operand.vmem [shape: f32[1,32], index: 4, kind: input, shape index: {}]   ;;  %s3799_s5 = inlined_call_operand.vmem [shape: bf16[32,32], index: 5, kind: input, shape index: {}]   ;;  %s3800_s6 = inlined_call_operand.vmem [shape: f32[1,32], index: 6, kind: input, shape index: {}]   ;;  %s3801_s7 = inlined_call_operand.hbm [shape: bf16[32,32], index: 7, kind: input, shape index: {}]   ;;  %s3802_s8 = inlined_call_operand.hbm [shape: f32[1,32], index: 8, kind: input, shape index: {}]   ;;  %s3803_s9 = inlined_call_operand.vmem [shape: bf16[32,32], index: 9, kind: input, shape index: {}]   ;;  %s3804_s10 = inlined_call_operand.vmem [shape: f32[1,32], index: 10, kind: input, shape index: {}]   ;;  %s3805_s11 = inlined_call_operand.vmem [shape: f32[1,32], index: 11, kind: input, shape index: {}]   ;;  %s3806_s12 = inlined_call_operand.vmem [shape: f32[1,32], index: 12, kind: input, shape index: {}]   ;;  %s3807_s13 = inlined_call_operand.hbm [shape: f32[2,8,32], index: 13, kind: output, shape index: {0}]   ;;  %s3808_s14 = inlined_call_operand.hbm [shape: f32[2,4,8,16], index: 14, kind: output, shape index: {1}]  }
   0x1   :  { %3838 = sst [smem:[#allocation29_spill]] %s3795_s1 }
   0x2   :  { %3839 = sst [smem:[#allocation30_spill]] %s3797_s3 }
   0x3   :  { %3840 = sst [smem:[#allocation31_spill]] %s3798_s4 }
   0x4   :  { %3841 = sst [smem:[#allocation32_spill]] %s3799_s5 }
   0x5   :  { %3842 = sst [smem:[#allocation33_spill]] %s3800_s6 }
   0x6   :  { %3843 = sst [smem:[#allocation34_spill]] %s3803_s9 }
   0x7   :  { %3844 = sst [smem:[#allocation35_spill]] %s3804_s10 }
   0x8   :  { %3845 = sst [smem:[#allocation36_spill]] %s3805_s11 }
   0x9   :  { %3846 = sst [smem:[#allocation37_spill]] %s3806_s12 }
   0xa   :  { %3847 = sst [smem:[#allocation38_spill]] %s3807_s13 }
   0xb   :  { %3848 = sst [smem:[#allocation39_spill]] %s3808_s14 }
   0xc   :  { %20 = vsyncpa [#allocation3], 0 }
   0xd   :  { %22 = vsyncpa [#allocation3 + $0x1], 0 }
   0xe   :  { %23 = vsyncpa [#allocation6], 0 }
   0xf   :  { %25 = vsyncpa [#allocation6 + $0x1], 0 }
  0x10   :  { %26 = vsyncpa [#allocation9], 0 }
  0x11   :  { %27 = vsyncpa [#allocation12], 0 }
  0x12   :  { %28 = vsyncpa [#allocation4], 0 }
  0x13   :  { %30 = vsyncpa [#allocation4 + $0x1], 0 }
  0x14   :  { %31 = vsyncpa [#allocation15], 0 }
  0x15   :  { %33 = vsyncpa [#allocation15 + $0x1], 0  ;;  %s3135_s29 = smov 0   ;;  %s3137_s30 = smov 0  }
  0x16   :  { %s3139_s15 = smov 0   ;;  %s3141_s16 = smov 0  }
  0x17 LB: > { %3849 = sst [smem:[#allocation22_spill]] %s3023_s29  ;;  %s3156_s17 = sadd.s32 4294967295, %s3035_s16   ;;  %s3035_s16 = sphi %s3141_s16, %s3899_s16   ;;  %s3031_s15 = sphi %s3139_s15, %s3901_s15   ;;  %s3027_s30 = sphi %s3137_s30, %s3903_s30   ;;  %s3023_s29 = sphi %s3135_s29, %s3902_s29  }
  0x18   : > { %3850 = sst [smem:[#allocation23_spill]] %s3031_s15  ;;  %s2439_s18 = sadd.s32 4294967294, %s3035_s16  }
  0x19   : > { %3851 = sst [smem:[#allocation24_spill]] %s3156_s17  ;;  %s3160_s19 = sadd.s32 1, %s3035_s16  }
  0x1a   : > { %3852 = sst [smem:[#allocation25_spill]] %s3160_s19  ;;  %s46_s20 = sadd.s32 1, %s3031_s15 }
  0x1b   : > { %s43_s21 = ssub.s32 %s3035_s16, %s3160_s19  ;;  %p53_p0 = scmp.ne.s32.totalorder %s3031_s15, %s3027_s30 }
  0x1c   : > { %p44_p1 = scmp.eq.s32.totalorder %s43_s21, 0  ;;  %p54_p2 = scmp.eq.s32.totalorder %s3035_s16, 0 }
  0x1d   : > { %p59_p3 = scmp.ne.s32.totalorder %s3027_s30, %s3023_s29  ;;  %p3815_p4 = scmp.eq.s32.totalorder %s3156_s17, 0 }
  0x1e   : > { %s3172_s22 = scalar_select %p44_p1, %s3031_s15, %s46_s20  }
  0x1f   : > { %p3174_p5 = por %p54_p2, %p53_p0  ;;  %p3180_p6 = por %p3815_p4, %p59_p3 }
  0x20   : > { %3853 = sst [smem:[#allocation26_spill]] %s3172_s22  ;;  %p345_p7 = scmp.eq.s32.totalorder %s3156_s17, 1 }
  0x21   : > { %s3854_s23 = scalar_select %p3174_p5, 1, 0 }
  0x22   : > { %s3855_s24 = scalar_select %p3180_p6, 1, 0 }
  0x23   : > { %p351_p8 = scmp.eq.s32.totalorder %s2439_s18, 1  ;;  %p2440_p9 = scmp.ge.s32.totalorder %s3035_s16, 1 }
  0x24   : > { %p384_p10 = scmp.lt.s32.totalorder %s3035_s16, 3  ;;  %p3187_p11 = por %p345_p7, %p53_p0 }
  0x25   : > { %p3191_p12 = por %p351_p8, %p59_p3  ;;  %s3037_s28 = smov [#allocation8]  }
  0x26   : > { %s3856_s25 = scalar_select %p3187_p11, 1, 0 }
  0x27   : > { %s3858_s26 = scalar_select %p3191_p12, 1, 0 }
  0x28   : > { %3857 = sst [smem:[#allocation27_spill]] %s3856_s25  ;;  %p3195_p13 = pnand %p2440_p9, %p384_p10 }
  0x29   : > { %3859 = sst [smem:[#allocation28_spill]] %s3858_s26  ;;  %s396_s20 = sshll.u32 %s3037_s28, 4  ;;  %s397_s20 = int_to_ptr.vmem [resolvable:$true] %s396_s20 }
  0x2a   : > { %s3860_s27 = scalar_select %p3195_p13, 1, 0 }
  0x2b   : > { %p2640_p1 = pneg %p3195_p13  ;;  %s3210_s21 = sand.u32 1, %s3031_s15  }
  0x2c   : > { %s473_s22 = sand.u32 1, %s3035_s16   ;;  %s3862_s3 = sld [smem:[#allocation30_spill]] }
  0x2d   : > { %p3203_p2 = pnand %p2640_p1, %p3815_p4 }
  0x2f   : > { %s3861_s18 = scalar_select %p3203_p2, 1, 0 }
  0x30   : > { %p3221_p8 = pneg %p3203_p2 }
  0x32   : > { %s2751_s29 = scalar_lea.hbm %s3862_s3, 256 }
  0x33   : > { %p2752_p7 = scmp.ne.s32.totalorder %s3862_s3, %s2751_s29  ;;  %p2758_p1 = scmp.lt.u32.totalorder %s2751_s29, %s3862_s3 }
  0x34   : > { %s3863_s28 = scalar_select %p3221_p8, 1, 0 }
  0x35   : > { %p2754_p9 = pnand %p3221_p8, %p2752_p7 }
  0x37   : > { %p2755_p10 = pneg %p2754_p9 }
  0x39   : > { %p2760_p0 = pnand %p2758_p1, %p2755_p10 }
  0x3b   : > { %2763 = shalt.err (!%p2760_p0)
}
  0x3c   : > { %s2764_s19 = scalar_lea.vmem %s397_s20, 256  ;;  %p2772_p11 = scmp.lt.s32.totalorder %s397_s20, %s397_s20 }
  0x3d   : > { %p2765_p4 = scmp.ne.s32.totalorder %s397_s20, %s2764_s19  ;;  %p2773_p6 = scmp.lt.s32.totalorder %s2764_s19, %s2764_s19 }
  0x3f   : > { %p2767_p3 = pnand %p2765_p4, %p3221_p8  ;;  %p2774_p13 = por %p2773_p6, %p2772_p11 }
  0x41   : > { %p2768_p12 = pneg %p2767_p3 }
  0x43   : > { %p2775_p5 = pnand %p2774_p13, %p2768_p12 }
  0x45   : > { %2778 = shalt.err (!%p2775_p5)
}
  0x46   : > { %s3822_s12 = smov 64   ;;  %s3823_s11 = smov 4  }
  0x47   : > { %2643 = dma.hbm_to_vmem [thread:$0]  (!%p3203_p2), %s3862_s3, 256, %s397_s20, [#allocation9], %s3822_s12, %s3822_s12, %s3823_s11  }
  0x48   : > { %p3864_p4 = scmp.ne.s32.totalorder %s3854_s23, 0  ;;  %p3865_p6 = scmp.lt.s32.totalorder %s3035_s16, 2 }
  0x49   : > { %s3824_s26 = sshll.u32 %s3210_s21, 4  ;;  %s2507_s19 = sshll.u32 %s3035_s16, 8 }
  0x4a   : > { %p3244_p5 = pnand %p3865_p6, %p3864_p4  ;;  %s3867_s1 = sld [smem:[#allocation29_spill]] }
  0x4b   : > { %s477_s23 = scalar_lea.vmem [#allocation5], %s3824_s26  ;;  %s3261_s13 = scalar_lea.sflag [#allocation6], %s473_s22 }
  0x4c   : > { %s3866_s15 = scalar_select %p3244_p5, 1, 0 }
  0x4d   : > { %s484_s20 = sshll.u32 %s477_s23, 4  ;;  %p3267_p12 = pneg %p3244_p5  ;;  %s3259_s20 = int_to_ptr.vmem [resolvable:$true] %s484_s20 }
  0x4f   : > { %s3868_s12 = scalar_select %p3267_p12, 1, 0 }
  0x50   : > { %s3255_s10 = scalar_lea.hbm %s3867_s1, %s2507_s19  ;;  %s2784_s11 = scalar_lea.hbm %s3867_s1, 512 }
  0x51   : > { %s2779_s29 = scalar_lea.hbm %s3255_s10, 256  ;;  %p2785_p3 = scmp.lt.u32.totalorder %s3255_s10, %s3867_s1 }
  0x52   : > { %p2780_p11 = scmp.ne.s32.totalorder %s3255_s10, %s2779_s29  ;;  %p2786_p7 = scmp.lt.u32.totalorder %s2784_s11, %s2779_s29 }
  0x53   : > { %p2788_p10 = scmp.lt.u32.totalorder %s2779_s29, %s3255_s10 }
  0x54   : > { %p2782_p13 = pnand %p3267_p12, %p2780_p11  ;;  %p2787_p9 = por %p2786_p7, %p2785_p3 }
  0x56   : > { %p2783_p0 = pneg %p2782_p13  ;;  %p2789_p1 = por %p2788_p10, %p2787_p9 }
  0x58   : > { %p2790_p4 = pnand %p2789_p1, %p2783_p0 }
  0x5a   : > { %2793 = shalt.err (!%p2790_p4)
}
  0x5b   : > { %s2794_s22 = scalar_lea.vmem %s3259_s20, 256  ;;  %s3040_s14 = smov [#allocation5]  }
  0x5c   : > { %p2795_p6 = scmp.ne.s32.totalorder %s3259_s20, %s2794_s22  ;;  %s2799_s25 = sshll.u32 %s3040_s14, 4  ;;  %s2800_s25 = int_to_ptr.vmem [resolvable:$false] %s2799_s25 }
  0x5d   : > { %s2801_s26 = scalar_lea.vmem %s2800_s25, 512  ;;  %p2802_p2 = scmp.lt.s32.totalorder %s3259_s20, %s2800_s25 }
  0x5e   : > { %p2797_p11 = pnand %p2795_p6, %p3267_p12  ;;  %p2803_p8 = scmp.lt.s32.totalorder %s2801_s26, %s2794_s22 }
  0x60   : > { %p2798_p13 = pneg %p2797_p11  ;;  %p2804_p3 = por %p2803_p8, %p2802_p2 }
  0x62   : > { %p2805_p7 = pnand %p2804_p3, %p2798_p13 }
  0x64   : > { %2808 = shalt.err (!%p2805_p7)
}
  0x65   : > { %s3833_s11 = smov 128   ;;  %s3042_s29 = smov 8  }
  0x66   : > { %2656 = dma.hbm_to_vmem [thread:$0]  (!%p3244_p5), %s3255_s10, 256, %s3259_s20, %s3261_s13, %s3833_s11, %s3833_s11, %s3042_s29  }
  0x67   : > { %s3299_s14 = scalar_lea.hbm %s3796_s2, %s2507_s19  ;;  %s3869_s25 = sshll.u32 %s3210_s21, 4 }
  0x68   : > { %s3303_s26 = scalar_lea.vmem [#allocation7], %s3869_s25  ;;  %s3043_s3 = smov [#allocation10]  }
  0x69   : > { %s505_s1 = sshll.u32 %s3303_s26, 4  ;;  %s418_s9 = sshll.u32 %s3043_s3, 4  ;;  %s419_s9 = int_to_ptr.vmem [resolvable:$true] %s418_s9  ;;  %s3354_s1 = int_to_ptr.vmem [resolvable:$true] %s505_s1 }
  0x6a   : > { %s3044_s4 = smov [#allocation11]   ;;  %s2809_s10 = scalar_lea.hbm %s3801_s7, 256 }
  0x6b   : > { %s432_s6 = sshll.u32 %s3044_s4, 4  ;;  %p2810_p2 = scmp.ne.s32.totalorder %s3801_s7, %s2809_s10  ;;  %s433_s6 = int_to_ptr.vmem [resolvable:$true] %s432_s6 }
  0x6c   : > { %p3870_p8 = scmp.ne.s32.totalorder %s3863_s28, 0  ;;  %p2816_p10 = scmp.lt.u32.totalorder %s2809_s10, %s3801_s7 }
  0x6e   : > { %p2812_p0 = pnand %p2810_p2, %p3870_p8 }
  0x70   : > { %p2813_p9 = pneg %p2812_p0 }
  0x72   : > { %p2818_p1 = pnand %p2816_p10, %p2813_p9 }
  0x74   : > { %2821 = shalt.err (!%p2818_p1)
}
  0x75   : > { %s2822_s3 = scalar_lea.vmem %s419_s9, 256  ;;  %p2830_p13 = scmp.lt.s32.totalorder %s419_s9, %s419_s9 }
  0x76   : > { %p2823_p4 = scmp.ne.s32.totalorder %s419_s9, %s2822_s3  ;;  %p2831_p3 = scmp.lt.s32.totalorder %s2822_s3, %s2822_s3 }
  0x78   : > { %p2825_p6 = pnand %p2823_p4, %p3870_p8  ;;  %p2832_p7 = por %p2831_p3, %p2830_p13 }
  0x7a   : > { %p2826_p11 = pneg %p2825_p6 }
  0x7c   : > { %p2833_p5 = pnand %p2832_p7, %p2826_p11 }
  0x7e   : > { %2836 = shalt.err (!%p2833_p5)
}
  0x7f   : > { %p3871_p2 = scmp.ne.s32.totalorder %s3861_s18, 0  ;;  %s3872_s4 = smov 4  }
  0x80   : > { %s3873_s5 = smov 64   ;;  %s2837_s10 = scalar_lea.hbm %s3802_s8, 16 }
  0x81   : > { %2646 = dma.hbm_to_vmem [thread:$0]  (!%p3871_p2), %s3801_s7, 256, %s419_s9, [#allocation9], %s3873_s5, %s3873_s5, %s3872_s4  }
  0x82   : > { %p2838_p0 = scmp.ne.s32.totalorder %s3802_s8, %s2837_s10  ;;  %p2844_p10 = scmp.lt.u32.totalorder %s2837_s10, %s3802_s8 }
  0x84   : > { %p2840_p5 = pnand %p2838_p0, %p3870_p8 }
  0x86   : > { %p2841_p9 = pneg %p2840_p5 }
  0x88   : > { %p2846_p1 = pnand %p2844_p10, %p2841_p9 }
  0x8a   : > { %2849 = shalt.err (!%p2846_p1)
}
  0x8b   : > { %s2850_s17 = scalar_lea.vmem %s433_s6, 16  ;;  %s2857_s9 = scalar_lea.vmem %s433_s6, 32 }
  0x8c   : > { %p2851_p4 = scmp.ne.s32.totalorder %s433_s6, %s2850_s17  ;;  %p2858_p13 = scmp.lt.s32.totalorder %s433_s6, %s433_s6 }
  0x8d   : > { %p2859_p3 = scmp.lt.s32.totalorder %s2857_s9, %s2850_s17 }
  0x8e   : > { %p2853_p6 = pnand %p2851_p4, %p3870_p8 }
  0x8f   : > { %p2860_p7 = por %p2859_p3, %p2858_p13 }
  0x90   : > { %p2854_p11 = pneg %p2853_p6 }
  0x92   : > { %p2861_p12 = pnand %p2860_p7, %p2854_p11 }
  0x94   : > { %2864 = shalt.err (!%p2861_p12)
}
  0x95   : > { %2649 = dma.hbm_to_vmem [thread:$0]  (!%p3871_p2), %s3802_s8, 16, %s433_s6, [#allocation12]  }
  0x96   : > { %s2445_s28 = sshll.u32 %s3210_s21, 3  ;;  %s2446_s11 = sshll.u32 %s3035_s16, 7 }
  0x97   : > { %s3350_s10 = scalar_lea.hbm %s3794_s0, %s2446_s11  ;;  %s459_s18 = scalar_lea.vmem [#allocation2], %s2445_s28 }
  0x98   : > { %s466_s20 = sshll.u32 %s459_s18, 4  ;;  %s456_s19 = scalar_lea.sflag [#allocation3], %s3210_s21  ;;  %s467_s20 = int_to_ptr.vmem [resolvable:$true] %s466_s20 }
  0x99   : > { %s2865_s23 = scalar_lea.hbm %s3350_s10, 128  ;;  %p3874_p8 = scmp.ne.s32.totalorder %s3868_s12, 0 }
  0x9a   : > { %p2866_p12 = scmp.ne.s32.totalorder %s3350_s10, %s2865_s23  ;;  %s2870_s17 = scalar_lea.hbm %s3794_s0, 256 }
  0x9b   : > { %p2871_p5 = scmp.lt.u32.totalorder %s3350_s10, %s3794_s0  ;;  %p2872_p9 = scmp.lt.u32.totalorder %s2870_s17, %s2865_s23 }
  0x9c   : > { %p2868_p2 = pnand %p2866_p12, %p3874_p8  ;;  %p2874_p1 = scmp.lt.u32.totalorder %s2865_s23, %s3350_s10 }
  0x9d   : > { %p2873_p10 = por %p2872_p9, %p2871_p5 }
  0x9e   : > { %p2869_p0 = pneg %p2868_p2 }
  0x9f   : > { %p2875_p4 = por %p2874_p1, %p2873_p10 }
  0xa1   : > { %p2876_p6 = pnand %p2875_p4, %p2869_p0 }
  0xa3   : > { %2879 = shalt.err (!%p2876_p6)
}
  0xa4   : > { %s2880_s21 = scalar_lea.vmem %s467_s20, 128  ;;  %s3045_s4 = smov [#allocation2]  }
  0xa5   : > { %p2881_p11 = scmp.ne.s32.totalorder %s467_s20, %s2880_s21  ;;  %s2885_s5 = sshll.u32 %s3045_s4, 4  ;;  %s2886_s5 = int_to_ptr.vmem [resolvable:$false] %s2885_s5 }
  0xa6   : > { %s2887_s28 = scalar_lea.vmem %s2886_s5, 256  ;;  %p2888_p7 = scmp.lt.s32.totalorder %s467_s20, %s2886_s5 }
  0xa7   : > { %p2883_p13 = pnand %p2881_p11, %p3874_p8  ;;  %p2889_p12 = scmp.lt.s32.totalorder %s2887_s28, %s2880_s21 }
  0xa9   : > { %p2884_p3 = pneg %p2883_p13  ;;  %p2890_p2 = por %p2889_p12, %p2888_p7 }
  0xab   : > { %p2891_p5 = pnand %p2890_p2, %p2884_p3 }
  0xad   : > { %2894 = shalt.err (!%p2891_p5)
}
  0xae   : > { %p3875_p9 = scmp.ne.s32.totalorder %s3866_s15, 0  ;;  %s2895_s11 = scalar_lea.hbm %s3299_s14, 256 }
  0xaf   : > { %p2896_p0 = scmp.ne.s32.totalorder %s3299_s14, %s2895_s11  ;;  %s2900_s18 = scalar_lea.hbm %s3796_s2, 512 }
  0xb0   : > { %2653 = dma.hbm_to_vmem [thread:$0]  (!%p3875_p9), %s3350_s10, 128, %s467_s20, %s456_s19  }
  0xb1   : > { %p2898_p10 = pnand %p2896_p0, %p3874_p8  ;;  %p2901_p4 = scmp.lt.u32.totalorder %s3299_s14, %s3796_s2 }
  0xb2   : > { %p2902_p6 = scmp.lt.u32.totalorder %s2900_s18, %s2895_s11  ;;  %p2904_p13 = scmp.lt.u32.totalorder %s2895_s11, %s3299_s14 }
  0xb3   : > { %p2899_p1 = pneg %p2898_p10 }
  0xb4   : > { %p2903_p11 = por %p2902_p6, %p2901_p4 }
  0xb6   : > { %p2905_p3 = por %p2904_p13, %p2903_p11 }
  0xb8   : > { %p2906_p7 = pnand %p2905_p3, %p2899_p1 }
  0xba   : > { %2909 = shalt.err (!%p2906_p7)
}
  0xbb   : > { %s2910_s10 = scalar_lea.vmem %s3354_s1, 256  ;;  %s3046_s20 = smov [#allocation7]  }
  0xbc   : > { %p2911_p12 = scmp.ne.s32.totalorder %s3354_s1, %s2910_s10  ;;  %s2915_s19 = sshll.u32 %s3046_s20, 4  ;;  %s2916_s19 = int_to_ptr.vmem [resolvable:$false] %s2915_s19 }
  0xbd   : > { %s2917_s3 = scalar_lea.vmem %s2916_s19, 512  ;;  %p2918_p0 = scmp.lt.s32.totalorder %s3354_s1, %s2916_s19 }
  0xbe   : > { %p2913_p2 = pnand %p2911_p12, %p3874_p8  ;;  %p2919_p10 = scmp.lt.s32.totalorder %s2917_s3, %s2910_s10 }
  0xc0   : > { %p2914_p5 = pneg %p2913_p2  ;;  %p2920_p4 = por %p2919_p10, %p2918_p0 }
  0xc2   : > { %p2921_p6 = pnand %p2920_p4, %p2914_p5 }
  0xc4   : > { %2924 = shalt.err (!%p2921_p6)
}
  0xc5   : > { %s3876_s17 = smov 128   ;;  %p3877_p8 = scmp.ne.s32.totalorder %s3860_s27, 0 }
  0xc6   : > { %2659 = dma.hbm_to_vmem [thread:$0]  (!%p3875_p9), %s3299_s14, 256, %s3354_s1, %s3261_s13, %s3876_s17, %s3876_s17, %s3042_s29  }
  0xc7   : > { %517 = sbr.rel (%p3877_p8) target bundleno = 2081 (0x821), region = 72  ;;  %s3402_s12 = sand.u32 (!%p3877_p8), 1, %s3027_s30  }
  0xc8   : > { %s2454_s26 = sshll.u32 (!%p3877_p8), %s3402_s12, 3  ;;  %s520_s9 = scalar_lea.sflag (!%p3877_p8), [#allocation3], %s3402_s12 }
  0xc9   : > { %s3408_s15 = scalar_lea.vmem (!%p3877_p8), [#allocation2], %s2454_s26  ;;  %p3878_p1 = scmp.ne.s32.totalorder (!%p3877_p8), %s3855_s24, 0 }
  0xce   : > { %2998 = dma.done.wait (%p3878_p1), %s520_s9, 128  }
  0xcf   : > { %3000 = vsyncadd (%p3878_p1), %s520_s9, 4294967168  ;;  %s3879_s1 = sld [smem:[#allocation24_spill]]  ;;  %s2455_s13 = sshll.u32 %s3402_s12, 4 }
  0xd0   : > { %s532_s14 = scalar_lea.vmem [#allocation5], %s2455_s13 }
  0xd5   : > { %s528_s27 = sand.u32 1, %s3879_s1  }
  0xd6   : > { %s529_s29 = scalar_lea.sflag [#allocation6], %s528_s27 }
  0xd7   : > { %3002 = dma.done.wait (%p3878_p1), %s529_s29, 512  }
  0xd8   : > { %3004 = vsyncadd (%p3878_p1), %s529_s29, 4294966784  ;;  %s3420_s21 = scalar_lea.vmem [#allocation7], %s2455_s13  ;;  %p3880_p9 = scmp.eq.s32.totalorder %s3879_s1, 0 }
  0xda   : > { %3006 = dma.done.wait (%p3880_p9), [#allocation9], 512   ;;  %p3881_p11 = pmov %p3880_p9 }
  0xdb   : > { %p3882_p13 = pmov %p3880_p9 }
  0xdc   : > { %3008 = vsyncadd (%p3881_p11), [#allocation9], 4294966784 }
  0xdd   : > { %3010 = dma.done.wait (%p3882_p13), [#allocation12], 16   ;;  %p3883_p3 = pmov %p3880_p9 }
  0xde   : > { %v3047_v0 = vmov 0.0   ;;  %vm3048_vm0 = vmmov 0   ;;  %s3884_s5 = sld [smem:[#allocation32_spill]]  ;;  %v615_v3 = vld [vmem:[%s532_s14] sm:$0xff]  ;;  %v616_v4 = vld [vmem:[%s532_s14 + $0x8] sm:$0xff]  ;;  %vm643_vm1 = vcmask 261120   ;;  %v838_v32 = vlaneseq }
  0xdf   : > { %3012 = vsyncadd (%p3883_p3), [#allocation12], 4294967280  ;;  %2546 = vmatprep.subr.bf16.mxu1 %v3047_v0  ;;  %2550 = vmatprep.mubr.msk.bf16.mxu1 %vm3048_vm0, %v3047_v0  ;;  %v2727_v5 = vld [vmem:[#allocation8] sm:$0xff]   ;;  %v2728_v6 = vld [vmem:[#allocation8 + $0x8] sm:$0xff]   ;;  %v687_v7 = vpack.c.bf16 %v616_v4, %v615_v3  ;;  %s3885_s18 = sld [smem:[#allocation33_spill]]  ;;  %s3049_s23 = smov 112  }
  0xe0   : > { %2538 = vmatprep.subr.bf16.mxu0 %v3047_v0  ;;  %2542 = vmatprep.mubr.msk.bf16.mxu0 %vm3048_vm0, %v3047_v0  ;;  %v3444_v8 = vld [vmem:[%s3408_s15] sm:$0xff]  ;;  %v617_v12 = vld [vmem:[%s3420_s21] sm:$0xff]  ;;  %s3050_s6 = smov 120   ;;  %s3051_s10 = smov 104   ;;  %v3052_v30 = vmov 1983009808  }
  0xe1   : > { %2539 = vmatpush3.bf16.msra.mxu0 %v2727_v5  ;;  %v619_v9 = vpack.c.bf16 %v3444_v8, %v3444_v8  ;;  %v2729_v10 = vld [vmem:[#allocation10] sm:$0xff]   ;;  %v2730_v11 = vld [vmem:[#allocation10 + $0x8] sm:$0xff]   ;;  %s3886_s3 = sld [smem:[#allocation31_spill]]  ;;  %v2470_v28 = vld [vmem:[#allocation11] ss:$0 sm:$0xff]  ;;  %v836_v31 = vunpack.c.l.s4 %v3052_v30  ;;  %v839_v41 = vshrl.u32 %v838_v32, 7 }
  0xe2   : > { %2540 = vmatprep.subr.bf16.mxu0 %v3047_v0  ;;  %v618_v13 = vld [vmem:[%s3420_s21 + $0x8] sm:$0xff]  ;;  %v3053_v38 = vmov 1934713408   ;;  %vm1565_vm2 = vcmask 64512   ;;  %vm1754_vm3 = vcmask 130048   ;;  %s2461_s17 = sshll.u32 %s3402_s12, 5 }
  0xe3   : > { %v755_v14 = vpack.c.bf16 %v618_v13, %v617_v12  ;;  %v868_v39 = vunpack.c.l.s4 %v3053_v38  ;;  %v837_v40 = vunpack.c.0.s8 %v836_v31  ;;  %s3628_s9 = scalar_lea.vmem [#allocation14], %s2461_s17  ;;  %s3887_s13 = sld [smem:[#allocation34_spill]]  ;;  %vm2129_vm4 = vcmask 195584  }
  0xe4   : > { %v2725_v1 = vld [vmem:[%s3884_s5] sm:$0xff]   ;;  %v2726_v2 = vld [vmem:[%s3884_s5 + $0x8] sm:$0xff]   ;;  %s3054_s21 = smov 16   ;;  %s3055_s24 = smov 8  }
  0xe5   : > { %2547 = vmatpush3.bf16.msra.mxu1 %v2725_v1  ;;  %2541 = vmatpush3.bf16.msra.mxu0 %v2728_v6  ;;  %v2466_v15 = vld [vmem:[%s3885_s18] ss:$0 sm:$0xff]  ;;  %v869_v44 = vunpack.c.0.s8 %v868_v39  ;;  %v3492_v45 = vsub.s32 %v837_v40, %v839_v41  ;;  %s3056_s4 = smov 24   ;;  %s3888_s22 = sld [smem:[#allocation35_spill]] }
  0xe6   : > { %2548 = vmatprep.subr.bf16.mxu1 %v3047_v0  ;;  %2554 = vmatprep.subr.bf16.mxu0 %v3047_v0  ;;  %s3889_s25 = sld [smem:[#allocation27_spill]]  ;;  %s2509_s18 = sshll.u32 %s3879_s1, 9 }
  0xe7   : > { %v2462_v26 = vld [vmem:[%s3886_s3] ss:$0 sm:$0xff]  ;;  %v3494_v52 = vsub.s32 %v869_v44, %v839_v41  ;;  %s3890_s20 = sld [smem:[#allocation39_spill]]  ;;  %s2236_s3 = scalar_lea.sflag [#allocation15], %s3402_s12 }
  0xe8   : > { %2543 = vmatmul.mubr.msk.bf16.vlgmr.msra.gmra.mrb[0].mxu0 %vm643_vm1, %v619_v9  ;;  %s3057_s15 = smov [#allocation14]  }
  0xe9   : > { %2549 = vmatpush3.bf16.msra.mxu1 %v2726_v2  ;;  %2558 = vmatprep.mubr.msk.bf16.mxu0 %vm3048_vm0, %v3047_v0  ;;  %s2929_s27 = sshll.u32 %s3057_s15, 4  ;;  %s2930_s27 = int_to_ptr.vmem [resolvable:$false] %s2929_s27 }
  0xea   : > { %2562 = vmatprep.subr.bf16.mxu1 %v3047_v0  ;;  %2555 = vmatpush3.bf16.msra.mxu0 %v2729_v10 }
  0xeb   : > { %2556 = vmatprep.subr.bf16.mxu0 %v3047_v0 }
  0xec   : > { %2551 = vmatmul.mubr.msk.bf16.vlgmr.msra.gmra.mrb[0].mxu1 %vm643_vm1, %v687_v7  ;;  %p3891_p12 = scmp.ne.s32.totalorder %s3889_s25, 0 }
  0xed   : > { %2564 = vmatprep.mubr.msk.bf16.mxu1 %vm3048_vm0, %v3047_v0  ;;  %s3708_s19 = scalar_lea.hbm %s3890_s20, %s2509_s18 }
  0xee   : > { %2557 = vmatpush3.bf16.msra.mxu0 %v2730_v11 }
  0xef   : > { %2568 = vmatprep.subr.bf16.mxu0 %v3047_v0 }
  0xf1   : > { %2559 = vmatmul.mubr.msk.bf16.vlgmr.msra.gmra.mrb[4].mxu0 %vm643_vm1, %v755_v14 }
  0xf2   : > { %2570 = vmatprep.mubr.msk.bf16.mxu0 %vm3048_vm0, %v3047_v0 }
 0x1bb   : > { %v681_v21 = vpop.f32.mrb[0].mxu0 }
 0x1bc   : > { %v2544_v22 = vpop.f32.mrb[1].mxu0  ;;  %v3474_v27 = vadd.f32 %v2462_v26, %v681_v21 }
 0x1bd   : > { %v684_v24 = vpop.f32.mrb[2].mxu0 }
 0x1be   : > { %v2545_v25 = vpop.f32.mrb[3].mxu0 }
 0x1bf   : > { %v748_v16 = vpop.f32.mrb[0].mxu1 }
 0x1c0   : > { %v749_v17 = vadd.f32 %v2466_v15, %v748_v16  ;;  %v2552_v18 = vpop.f32.mrb[1].mxu1 }
 0x1c1   : > { %v751_v19 = vpop.f32.mrb[2].mxu1 }
 0x1c2   : > { %981 = vrot.lane.b32.xlu1 %v749_v17, %s3049_s23  ;;  %975 = vrot.lane.b32.xlu0 %v749_v17, %s3050_s6  ;;  %v2553_v20 = vpop.f32.mrb[3].mxu1  ;;  %v752_v23 = vadd.f32 %v2466_v15, %v751_v19 }
 0x1c4   : > { %v816_v29 = vpop.f32.mrb[4].mxu0 }
 0x1c5   : > { %v3484_v33 = vadd.f32 %v2470_v28, %v816_v29  ;;  %v2560_v34 = vpop.f32.mrb[5].mxu0 }
 0x1c6   : > { %987 = vrot.lane.b32.xlu0 %v749_v17, %s3051_s10  ;;  %983 = vrot.lane.b32.xlu1 %v752_v23, %s3049_s23  ;;  %v819_v35 = vpop.f32.mrb[6].mxu0 }
 0x1c7   : > { %v3486_v36 = vadd.f32 %v2470_v28, %v819_v35  ;;  %v2561_v37 = vpop.f32.mrb[7].mxu0 }
 0x1ca   : > { %989 = vrot.lane.b32.xlu1 %v752_v23, %s3051_s10  ;;  %977 = vrot.lane.b32.xlu0 %v752_v23, %s3050_s6 }
 0x1ce   : > { %827 = vrot.lane.b32.xlu1 %v3474_v27, %s3049_s23  ;;  %824 = vrot.lane.b32.xlu0 %v3474_v27, %s3050_s6 }
 0x1d2   : > { %830 = vrot.lane.b32.xlu0 %v3474_v27, %s3051_s10  ;;  %1273 = vrot.lane.b32.xlu1 %v3486_v36, %s3050_s6 }
 0x1d6   : > { %1271 = vrot.lane.b32.xlu0 %v3484_v33, %s3050_s6 }
 0x234   : > { %v982_v42 = vpop.permute.xlu1 %981  ;;  %v976_v43 = vpop.permute.xlu0 %975 }
 0x235   : > { %v993_v46 = vcombine.low %v749_v17, %v982_v42  ;;  %v994_v47 = vcombine.high %v749_v17, %v982_v42 }
 0x237   : > { %v1001_v53 = vrot.slane %v993_v46, %v3492_v45  ;;  %v1008_v54 = vrot.slane %v994_v47, %v3492_v45 }
 0x238   : > { %v988_v48 = vpop.permute.xlu0 %987  ;;  %v984_v49 = vpop.permute.xlu1 %983 }
 0x239   : > { %v1009_v50 = vcombine.low %v976_v43, %v988_v48  ;;  %v1010_v51 = vcombine.high %v976_v43, %v988_v48  ;;  %v1061_v57 = vcombine.low %v752_v23, %v984_v49  ;;  %v1062_v58 = vcombine.high %v752_v23, %v984_v49 }
 0x23b   : > { %v1017_v55 = vrot.slane %v1009_v50, %v3492_v45  ;;  %v1024_v56 = vrot.slane %v1010_v51, %v3492_v45  ;;  %v1069_v9 = vrot.slane %v1061_v57, %v3492_v45  ;;  %v1076_v10 = vrot.slane %v1062_v58, %v3492_v45 }
 0x23c   : > { %v990_v59 = vpop.permute.xlu1 %989  ;;  %v978_v60 = vpop.permute.xlu0 %977 }
 0x23d   : > { %v1025_v61 = vcombine.low %v1001_v53, %v1017_v55  ;;  %v1026_v62 = vcombine.high %v1001_v53, %v1017_v55  ;;  %v1041_v63 = vcombine.low %v1008_v54, %v1024_v56  ;;  %v1042_v1 = vcombine.high %v1008_v54, %v1024_v56 }
 0x23e   : > { %v1077_v2 = vcombine.low %v978_v60, %v990_v59  ;;  %v1078_v3 = vcombine.high %v978_v60, %v990_v59 }
 0x23f   : > { %v1033_v4 = vrot.slane %v1025_v61, %v3494_v52  ;;  %v1040_v5 = vrot.slane %v1026_v62, %v3494_v52  ;;  %v1049_v6 = vrot.slane %v1041_v63, %v3494_v52  ;;  %v1056_v7 = vrot.slane %v1042_v1, %v3494_v52 }
 0x240   : > { %v1085_v11 = vrot.slane %v1077_v2, %v3492_v45  ;;  %v1092_v12 = vrot.slane %v1078_v3, %v3492_v45  ;;  %v825_v13 = vpop.permute.xlu0 %824  ;;  %v828_v22 = vpop.permute.xlu1 %827 }
 0x241   : > { %v1129_v14 = vcombine.low %v1033_v4, %v1040_v5  ;;  %v2476_v15 = vcombine.high %v1033_v4, %v1040_v5  ;;  %v1145_v16 = vcombine.low %v1049_v6, %v1056_v7  ;;  %v2477_v17 = vcombine.high %v1049_v6, %v1056_v7 }
 0x242   : > { %v1093_v18 = vcombine.low %v1069_v9, %v1085_v11  ;;  %v1094_v19 = vcombine.high %v1069_v9, %v1085_v11  ;;  %v1109_v20 = vcombine.low %v1076_v10, %v1092_v12  ;;  %v1110_v21 = vcombine.high %v1076_v10, %v1092_v12 }
 0x243   : > { %v3509_v23 = vrot.slane %v1129_v14, %v3492_v45  ;;  %v3512_v24 = vrot.slane %v2476_v15, %v3492_v45  ;;  %v3515_v25 = vrot.slane %v1145_v16, %v3492_v45  ;;  %v3518_v26 = vrot.slane %v2477_v17, %v3492_v45 }
 0x244   : > { %v1101_v28 = vrot.slane %v1093_v18, %v3494_v52  ;;  %v1108_v29 = vrot.slane %v1094_v19, %v3494_v52  ;;  %v1117_v30 = vrot.slane %v1109_v20, %v3494_v52  ;;  %v1124_v31 = vrot.slane %v1110_v21, %v3494_v52  ;;  %v831_v32 = vpop.permute.xlu0 %830 }
 0x245   : > { %v833_v34 = vcombine.low %v3474_v27, %v828_v22  ;;  %v834_v35 = vcombine.high %v3474_v27, %v828_v22  ;;  %v849_v37 = vcombine.low %v825_v13, %v831_v32  ;;  %v850_v38 = vcombine.high %v825_v13, %v831_v32 }
 0x246   : > { %v1197_v39 = vcombine.low %v1101_v28, %v1108_v29  ;;  %v2478_v40 = vcombine.high %v1101_v28, %v1108_v29  ;;  %v1213_v41 = vcombine.low %v1117_v30, %v1124_v31  ;;  %v2479_v42 = vcombine.high %v1117_v30, %v1124_v31 }
 0x247   : > { %v841_v43 = vrot.slane %v833_v34, %v3492_v45  ;;  %v848_v44 = vrot.slane %v834_v35, %v3492_v45  ;;  %v857_v46 = vrot.slane %v849_v37, %v3492_v45  ;;  %v864_v47 = vrot.slane %v850_v38, %v3492_v45 }
 0x248   : > { %v1204_v48 = vrot.slane %v1197_v39, %v3492_v45  ;;  %v1212_v49 = vrot.slane %v2478_v40, %v3492_v45  ;;  %v1220_v27 = vrot.slane %v1213_v41, %v3492_v45  ;;  %v1228_v50 = vrot.slane %v2479_v42, %v3492_v45 }
 0x249   : > { %v865_v51 = vcombine.low %v841_v43, %v857_v46  ;;  %v866_v53 = vcombine.high %v841_v43, %v857_v46  ;;  %v881_v54 = vcombine.low %v848_v44, %v864_v47  ;;  %v882_v55 = vcombine.high %v848_v44, %v864_v47 }
 0x24a   : > { %v1161_v56 = vcombine.low %v3509_v23, %v3512_v24  ;;  %v1177_v57 = vcombine.low %v3515_v25, %v3518_v26  ;;  %v1229_v58 = vcombine.low %v1204_v48, %v1212_v49  ;;  %v1245_v59 = vcombine.low %v1220_v27, %v1228_v50 }
 0x24b   : > { %v873_v60 = vrot.slane %v865_v51, %v3494_v52  ;;  %v880_v61 = vrot.slane %v866_v53, %v3494_v52  ;;  %v889_v62 = vrot.slane %v881_v54, %v3494_v52  ;;  %v896_v63 = vrot.slane %v882_v55, %v3494_v52 }
 0x24c   : > { %v1169_v1 = vrot.slane %v1161_v56, %v3494_v52  ;;  %v1185_v2 = vrot.slane %v1177_v57, %v3494_v52  ;;  %v1237_v3 = vrot.slane %v1229_v58, %v3494_v52  ;;  %v1253_v4 = vrot.slane %v1245_v59, %v3494_v52 }
 0x24d   : > { %v901_v5 = vcombine.low %v873_v60, %v880_v61  ;;  %v2474_v6 = vcombine.high %v873_v60, %v880_v61  ;;  %v917_v7 = vcombine.low %v889_v62, %v896_v63  ;;  %v2475_v9 = vcombine.high %v889_v62, %v896_v63 }
 0x24e   : > { %v1193_v10 = vcombine.low %v1169_v1, %v1185_v2  ;;  %v1261_v11 = vcombine.low %v1237_v3, %v1253_v4  ;;  %v1194_v12 = vcombine.high %v1169_v1, %v1185_v2  ;;  %v1262_v13 = vcombine.high %v1237_v3, %v1253_v4 }
 0x24f   : > { %v908_v14 = vrot.slane %v901_v5, %v3492_v45  ;;  %v916_v15 = vrot.slane %v2474_v6, %v3492_v45  ;;  %v924_v16 = vrot.slane %v917_v7, %v3492_v45  ;;  %v932_v17 = vrot.slane %v2475_v9, %v3492_v45 }
 0x250   : > { %v1265_v18 = vpack.c.bf16 %v1261_v11, %v1193_v10  ;;  %v1266_v19 = vpack.c.bf16 %v1262_v13, %v1194_v12  ;;  %v1162_v20 = vcombine.high %v3509_v23, %v3512_v24  ;;  %v1178_v21 = vcombine.high %v3515_v25, %v3518_v26 }
 0x251   : > { %v933_v22 = vcombine.low %v908_v14, %v916_v15  ;;  %v949_v28 = vcombine.low %v924_v16, %v932_v17  ;;  %v1230_v34 = vcombine.high %v1204_v48, %v1212_v49  ;;  %v1246_v25 = vcombine.high %v1220_v27, %v1228_v50 }
 0x252   : > { %v1570_v29 = vsel %vm1565_vm2, %v1265_v18, 0  ;;  %v1616_v30 = vsel %vm1565_vm2, %v1266_v19, 0  ;;  %v1176_v23 = vrot.slane %v1162_v20, %v3494_v52  ;;  %v1192_v24 = vrot.slane %v1178_v21, %v3494_v52  ;;  %v1272_v20 = vpop.permute.xlu0 %1271  ;;  %v1274_v21 = vpop.permute.xlu1 %1273 }
 0x253   : > { %2563 = vmatpush3.bf16.xpose.msra.mxu1 %v1570_v29  ;;  %2569 = vmatpush3.bf16.xpose.msra.mxu0 %v1616_v30  ;;  %v941_v31 = vrot.slane %v933_v22, %v3494_v52  ;;  %v957_v32 = vrot.slane %v949_v28, %v3494_v52  ;;  %v934_v26 = vcombine.high %v908_v14, %v916_v15 }
 0x254   : > { %2574 = vmatprep.subr.bf16.mxu1 %v3047_v0  ;;  %2580 = vmatprep.subr.bf16.mxu0 %v3047_v0  ;;  %v1244_v38 = vrot.slane %v1230_v34, %v3494_v52  ;;  %v950_v39 = vcombine.high %v924_v16, %v932_v17  ;;  %v1260_v40 = vrot.slane %v1246_v25, %v3494_v52 }
 0x255   : > { %v965_v35 = vcombine.low %v941_v31, %v957_v32  ;;  %v966_v37 = vcombine.high %v941_v31, %v957_v32  ;;  %v1195_v43 = vcombine.low %v1176_v23, %v1192_v24  ;;  %v1196_v46 = vcombine.high %v1176_v23, %v1192_v24 }
 0x256   : > { %v1263_v44 = vcombine.low %v1244_v38, %v1260_v40  ;;  %v1264_v47 = vcombine.high %v1244_v38, %v1260_v40  ;;  %v948_v48 = vrot.slane %v934_v26, %v3494_v52  ;;  %v964_v50 = vrot.slane %v950_v39, %v3494_v52 }
 0x257   : > { %v969_v41 = vpack.c.bf16 %v965_v35, %v965_v35  ;;  %v970_v42 = vpack.c.bf16 %v966_v37, %v966_v37 }
 0x258   : > { %v1267_v49 = vpack.c.bf16 %v1263_v44, %v1195_v43  ;;  %v1268_v27 = vpack.c.bf16 %v1264_v47, %v1196_v46  ;;  %v967_v54 = vcombine.low %v948_v48, %v964_v50  ;;  %v968_v55 = vcombine.high %v948_v48, %v964_v50 }
 0x25a   : > { %2565 = vmatmul.mubr.msk.bf16.vlgmr.msra.gmra.mrb[4].mxu1 %vm1565_vm2, %v969_v41  ;;  %2571 = vmatmul.mubr.msk.bf16.vlgmr.msra.gmra.mrb[8].mxu0 %vm1565_vm2, %v970_v42  ;;  %v1662_v51 = vsel %vm1565_vm2, %v1267_v49, 0  ;;  %v1708_v53 = vsel %vm1565_vm2, %v1268_v27, 0  ;;  %v971_v56 = vpack.c.bf16 %v967_v54, %v967_v54  ;;  %v972_v57 = vpack.c.bf16 %v968_v55, %v968_v55 }
 0x25b   : > { %2576 = vmatprep.mubr.msk.bf16.mxu1 %vm3048_vm0, %v3047_v0  ;;  %2582 = vmatprep.mubr.msk.bf16.mxu0 %vm3048_vm0, %v3047_v0 }
 0x25c   : > { %2575 = vmatpush3.bf16.xpose.msra.mxu1 %v1662_v51  ;;  %2581 = vmatpush3.bf16.xpose.msra.mxu0 %v1708_v53 }
 0x25d   : > { %2586 = vmatprep.subr.bf16.mxu1 %v3047_v0  ;;  %2592 = vmatprep.subr.bf16.mxu0 %v3047_v0 }
 0x263   : > { %2577 = vmatmul.mubr.msk.bf16.vlgmr.msra.gmra.mrb[8].mxu1 %vm1565_vm2, %v971_v56  ;;  %2583 = vmatmul.mubr.msk.bf16.vlgmr.msra.gmra.mrb[12].mxu0 %vm1565_vm2, %v972_v57 }
 0x264   : > { %2588 = vmatprep.mubr.msk.bf16.mxu1 %vm3048_vm0, %v3047_v0  ;;  %2594 = vmatprep.mubr.msk.bf16.mxu0 %vm3048_vm0, %v3047_v0 }
 0x32d   : > { %v1606_v58 = vpop.f32.mrb[4].mxu1  ;;  %v1652_v59 = vpop.f32.mrb[8].mxu0 }
 0x32e   : > { %v1750_v60 = vmul.f32 0.35355338, %v1606_v58  ;;  %v1751_v61 = vmul.f32 0.35355338, %v1652_v59  ;;  %v2566_v62 = vpop.f32.mrb[5].mxu1  ;;  %v2572_v63 = vpop.f32.mrb[9].mxu0 }
 0x32f   : > { %v1609_v1 = vpop.f32.mrb[6].mxu1  ;;  %v1655_v2 = vpop.f32.mrb[10].mxu0 }
 0x330   : > { %v2567_v3 = vpop.f32.mrb[7].mxu1  ;;  %v2573_v4 = vpop.f32.mrb[11].mxu0  ;;  %v1755_v5 = vsel %vm1754_vm3, %v1750_v60, -inf  ;;  %v1758_v6 = vsel %vm1754_vm3, %v1751_v61, -inf }
 0x331   : > { %1756 = vmax.xlane.f32.xlu1 %v1755_v5  ;;  %1759 = vmax.xlane.f32.xlu0 %v1758_v6 }
 0x336   : > { %v1698_v7 = vpop.f32.mrb[8].mxu1  ;;  %v1744_v9 = vpop.f32.mrb[12].mxu0 }
 0x337   : > { %v1752_v10 = vmul.f32 0.35355338, %v1698_v7  ;;  %v1753_v11 = vmul.f32 0.35355338, %v1744_v9  ;;  %v2578_v12 = vpop.f32.mrb[9].mxu1  ;;  %v2584_v13 = vpop.f32.mrb[13].mxu0 }
 0x338   : > { %v1701_v14 = vpop.f32.mrb[10].mxu1  ;;  %v1747_v15 = vpop.f32.mrb[14].mxu0 }
 0x339   : > { %v2579_v16 = vpop.f32.mrb[11].mxu1  ;;  %v2585_v17 = vpop.f32.mrb[15].mxu0  ;;  %v1761_v18 = vsel %vm1754_vm3, %v1752_v10, -inf  ;;  %v1764_v19 = vsel %vm1754_vm3, %v1753_v11, -inf }
 0x33a   : > { %1762 = vmax.xlane.f32.xlu0 %v1761_v18  ;;  %1765 = vmax.xlane.f32.xlu1 %v1764_v19 }
 0x34b   : > { %1277 = vrot.lane.b32.xlu1 %v3484_v33, %s3049_s23 }
 0x350   : > { %1279 = vrot.lane.b32.xlu0 %v3486_v36, %s3049_s23  ;;  %s2262_s23 = sshll.u32 %s3628_s9, 4  ;;  %s3710_s23 = int_to_ptr.vmem [resolvable:$true] %s2262_s23 }
 0x351   : > { %s2925_s17 = scalar_lea.vmem %s3710_s23, 512  ;;  %p2932_p0 = scmp.lt.s32.totalorder %s3710_s23, %s2930_s27 }
 0x352   : > { %p2926_p7 = scmp.ne.s32.totalorder %s3710_s23, %s2925_s17 }
 0x354   : > { %p2927_p2 = pnand %p2926_p7, %p3891_p12 }
 0x356   : > { %p2928_p5 = pneg %p2927_p2 }
 0x3be   : > { %v1757_v22 = vpop.xlane.xlu1 %1756  ;;  %v1760_v28 = vpop.xlane.xlu0 %1759 }
 0x3bf   : > { %v1767_v29 = vsub.f32 %v1750_v60, %v1757_v22  ;;  %v1768_v30 = vsub.f32 %v1751_v61, %v1760_v28 }
 0x3c1   : > { %v1771_v31 = vmul.f32 1.442695, %v1767_v29  ;;  %v1773_v32 = vmul.f32 1.442695, %v1768_v30 }
 0x3c3   : > { %2733 = vpow2.f32 %v1771_v31 }
 0x3c4   : > { %2735 = vpow2.f32 %v1773_v32 }
 0x3c7   : > { %v1766_v26 = vpop.xlane.xlu1 %1765  ;;  %v1763_v35 = vpop.xlane.xlu0 %1762 }
 0x3c8   : > { %v1770_v37 = vsub.f32 %v1753_v11, %v1766_v26  ;;  %v1769_v38 = vsub.f32 %v1752_v10, %v1763_v35 }
 0x3ca   : > { %v1777_v39 = vmul.f32 1.442695, %v1770_v37  ;;  %v1775_v40 = vmul.f32 1.442695, %v1769_v38 }
 0x3cb   : > { %v1280_v46 = vpop.permute.xlu0 %1279  ;;  %v1278_v47 = vpop.permute.xlu1 %1277 }
 0x3cc   : > { %2737 = vpow2.f32 %v1777_v39  ;;  %v1357_v27 = vcombine.low %v3486_v36, %v1280_v46  ;;  %v1358_v50 = vcombine.high %v3486_v36, %v1280_v46  ;;  %v1289_v51 = vcombine.low %v3484_v33, %v1278_v47 }
 0x3cd   : > { %v2734_v34 = vpop.eup %2733  ;;  %2739 = vpow2.f32 %v1775_v40  ;;  %v1290_v53 = vcombine.high %v3484_v33, %v1278_v47 }
 0x3ce   : > { %v3590_v23 = vpop.eup %2735  ;;  %v1779_v24 = vsel %vm1754_vm3, %v2734_v34, 0.0  ;;  %v1365_v60 = vrot.slane %v1357_v27, %v3492_v45  ;;  %v1372_v61 = vrot.slane %v1358_v50, %v3492_v45 }
 0x3cf   : > { %1780 = vadd.xlane.f32.xlu0 %v1779_v24  ;;  %v1782_v25 = vsel %vm1754_vm3, %v3590_v23, 0.0  ;;  %v1304_v1 = vrot.slane %v1290_v53, %v3492_v45 }
 0x3d0   : > { %1783 = vadd.xlane.f32.xlu1 %v1782_v25 }
 0x3d6   : > { %v3599_v41 = vpop.eup %2737 }
 0x3d7   : > { %v3601_v42 = vpop.eup %2739  ;;  %v1788_v43 = vsel %vm1754_vm3, %v3599_v41, 0.0 }
 0x3d8   : > { %v1785_v44 = vsel %vm1754_vm3, %v3601_v42, 0.0 }
 0x3e1   : > { %1283 = vrot.lane.b32.xlu1 %v3484_v33, %s3051_s10 }
 0x3e5   : > { %1285 = vrot.lane.b32.xlu0 %v3486_v36, %s3051_s10  ;;  %v1297_v36 = vrot.slane %v1289_v51, %v3492_v45 }
 0x404   : > { %1789 = vadd.xlane.f32.xlu0 %v1788_v43 }
 0x405   : > { %1786 = vadd.xlane.f32.xlu1 %v1785_v44 }
 0x45c   : > { %v1781_v48 = vpop.xlane.xlu0 %1780 }
 0x45d   : > { %2741 = vrcp.f32 %v1781_v48  ;;  %v1784_v49 = vpop.xlane.xlu1 %1783 }
 0x45e   : > { %2743 = vrcp.f32 %v1784_v49 }
 0x460   : > { %v1286_v54 = vpop.permute.xlu0 %1285 }
 0x461   : > { %v1373_v55 = vcombine.low %v1274_v21, %v1286_v54  ;;  %v1374_v56 = vcombine.high %v1274_v21, %v1286_v54  ;;  %v1284_v57 = vpop.permute.xlu1 %1283 }
 0x462   : > { %v1305_v58 = vcombine.low %v1272_v20, %v1284_v57  ;;  %v1306_v59 = vcombine.high %v1272_v20, %v1284_v57 }
 0x463   : > { %v1381_v62 = vrot.slane %v1373_v55, %v3492_v45  ;;  %v1388_v63 = vrot.slane %v1374_v56, %v3492_v45 }
 0x464   : > { %v1313_v33 = vrot.slane %v1305_v58, %v3492_v45  ;;  %v1320_v2 = vrot.slane %v1306_v59, %v3492_v45 }
 0x465   : > { %v1389_v3 = vcombine.low %v1365_v60, %v1381_v62  ;;  %v1390_v4 = vcombine.high %v1365_v60, %v1381_v62  ;;  %v1405_v5 = vcombine.low %v1372_v61, %v1388_v63  ;;  %v1406_v6 = vcombine.high %v1372_v61, %v1388_v63 }
 0x466   : > { %v1321_v7 = vcombine.low %v1297_v36, %v1313_v33  ;;  %v1322_v9 = vcombine.high %v1297_v36, %v1313_v33  ;;  %v1337_v10 = vcombine.low %v1304_v1, %v1320_v2  ;;  %v1338_v11 = vcombine.high %v1304_v1, %v1320_v2 }
 0x467   : > { %v2742_v12 = vpop.eup %2741  ;;  %v1397_v13 = vrot.slane %v1389_v3, %v3494_v52  ;;  %v1404_v14 = vrot.slane %v1390_v4, %v3494_v52  ;;  %v1413_v15 = vrot.slane %v1405_v5, %v3494_v52  ;;  %v1420_v16 = vrot.slane %v1406_v6, %v3494_v52 }
 0x468   : > { %v2744_v17 = vpop.eup %2743  ;;  %v1795_v18 = vmul.f32 %v2742_v12, %v2734_v34  ;;  %v1329_v19 = vrot.slane %v1321_v7, %v3494_v52  ;;  %v1336_v20 = vrot.slane %v1322_v9, %v3494_v52  ;;  %v1345_v21 = vrot.slane %v1337_v10, %v3494_v52 }
 0x469   : > { %v1796_v22 = vmul.f32 %v2744_v17, %v3590_v23  ;;  %v1493_v28 = vcombine.low %v1397_v13, %v1404_v14  ;;  %v2482_v29 = vcombine.high %v1397_v13, %v1404_v14  ;;  %v1509_v30 = vcombine.low %v1413_v15, %v1420_v16 }
 0x46a   : > { %1799 = vst.msk [vmem:[%s3628_s9] sm:$0xff] %vm1754_vm3, %v1795_v18  ;;  %v2483_v31 = vcombine.high %v1413_v15, %v1420_v16  ;;  %v1352_v32 = vrot.slane %v1338_v11, %v3494_v52  ;;  %v1425_v34 = vcombine.low %v1329_v19, %v1336_v20  ;;  %v2480_v24 = vcombine.high %v1329_v19, %v1336_v20 }
 0x46b   : > { %1800 = vst.msk [vmem:[%s3628_s9 + $0x8] sm:$0xff] %vm1754_vm3, %v1796_v22  ;;  %v1500_v25 = vrot.slane %v1493_v28, %v3492_v45  ;;  %v1508_v23 = vrot.slane %v2482_v29, %v3492_v45  ;;  %v1516_v26 = vrot.slane %v1509_v30, %v3492_v45  ;;  %v1803_v7 = vpack.c.bf16 %v1795_v18, %v1795_v18 }
 0x46c   : > { %v1524_v35 = vrot.slane %v2483_v31, %v3492_v45  ;;  %v1432_v37 = vrot.slane %v1425_v34, %v3492_v45  ;;  %v1440_v38 = vrot.slane %v2480_v24, %v3492_v45  ;;  %v1441_v39 = vcombine.low %v1345_v21, %v1352_v32 }
 0x46d   : > { %v2481_v40 = vcombine.high %v1345_v21, %v1352_v32  ;;  %v1525_v43 = vcombine.low %v1500_v25, %v1508_v23  ;;  %v1526_v44 = vcombine.high %v1500_v25, %v1508_v23  ;;  %v1804_v9 = vpack.c.bf16 %v1796_v22, %v1796_v22 }
 0x46e   : > { %v1448_v46 = vrot.slane %v1441_v39, %v3492_v45  ;;  %v1457_v47 = vcombine.low %v1432_v37, %v1440_v38  ;;  %v1541_v48 = vcombine.low %v1516_v26, %v1524_v35  ;;  %v1458_v49 = vcombine.high %v1432_v37, %v1440_v38 }
 0x46f   : > { %v1456_v27 = vrot.slane %v2481_v40, %v3492_v45  ;;  %v1533_v50 = vrot.slane %v1525_v43, %v3494_v52  ;;  %v1542_v51 = vcombine.high %v1516_v26, %v1524_v35  ;;  %v1540_v58 = vrot.slane %v1526_v44, %v3494_v52 }
 0x470   : > { %v1549_v53 = vrot.slane %v1541_v48, %v3494_v52  ;;  %v1465_v54 = vrot.slane %v1457_v47, %v3494_v52  ;;  %v1472_v57 = vrot.slane %v1458_v49, %v3494_v52 }
 0x471   : > { %v1473_v55 = vcombine.low %v1448_v46, %v1456_v27  ;;  %v1474_v56 = vcombine.high %v1448_v46, %v1456_v27  ;;  %v1556_v59 = vrot.slane %v1542_v51, %v3494_v52  ;;  %v2731_v51 = vld [vmem:[%s3887_s13] sm:$0xff]  }
 0x472   : > { %v1557_v61 = vcombine.low %v1533_v50, %v1549_v53  ;;  %v1558_v62 = vcombine.high %v1533_v50, %v1549_v53 }
 0x473   : > { %v1481_v60 = vrot.slane %v1473_v55, %v3494_v52  ;;  %v1488_v63 = vrot.slane %v1474_v56, %v3494_v52  ;;  %v1559_v33 = vcombine.low %v1540_v58, %v1556_v59  ;;  %v1560_v2 = vcombine.high %v1540_v58, %v1556_v59 }
 0x475   : > { %v1489_v36 = vcombine.low %v1465_v54, %v1481_v60  ;;  %v1490_v1 = vcombine.high %v1465_v54, %v1481_v60  ;;  %v1491_v5 = vcombine.low %v1472_v57, %v1488_v63  ;;  %v1492_v6 = vcombine.high %v1472_v57, %v1488_v63 }
 0x477   : > { %v1561_v3 = vpack.c.bf16 %v1557_v61, %v1489_v36  ;;  %v1562_v4 = vpack.c.bf16 %v1558_v62, %v1490_v1  ;;  %v1563_v10 = vpack.c.bf16 %v1559_v33, %v1491_v5  ;;  %v1564_v11 = vpack.c.bf16 %v1560_v2, %v1492_v6  ;;  %v2732_v1 = vld [vmem:[%s3887_s13 + $0x8] sm:$0xff]  }
 0x479   : > { %2587 = vmatpush3.bf16.msra.mxu1 %v1561_v3  ;;  %2593 = vmatpush3.bf16.msra.mxu0 %v1562_v4 }
 0x47a   : > { %2598 = vmatprep.subr.bf16.mxu1 %v3047_v0  ;;  %2604 = vmatprep.subr.bf16.mxu0 %v3047_v0 }
 0x47c   : > { %2589 = vmatmul.mubr.msk.bf16.vlgmr.msra.gmra.mrb[12].mxu1 %vm1754_vm3, %v1803_v7  ;;  %2595 = vmatmul.mubr.msk.bf16.vlgmr.msra.gmra.mrb[16].mxu0 %vm1754_vm3, %v1804_v9 }
 0x47d   : > { %2599 = vmatpush3.bf16.msra.mxu1 %v1563_v10  ;;  %2605 = vmatpush3.bf16.msra.mxu0 %v1564_v11 }
 0x47e   : > { %2600 = vmatprep.mubr.msk.bf16.mxu1 %vm3048_vm0, %v3047_v0  ;;  %2606 = vmatprep.mubr.msk.bf16.mxu0 %vm3048_vm0, %v3047_v0 }
 0x47f   : > { %2610 = vmatprep.subr.bf16.mxu1 %v3047_v0 }
 0x491   : > { %v1790_v12 = vpop.xlane.xlu0 %1789 }
 0x492   : > { %2745 = vrcp.f32 %v1790_v12  ;;  %v1787_v13 = vpop.xlane.xlu1 %1786 }
 0x493   : > { %2747 = vrcp.f32 %v1787_v13 }
 0x49c   : > { %v2746_v14 = vpop.eup %2745 }
 0x49d   : > { %v2748_v15 = vpop.eup %2747  ;;  %v1798_v16 = vmul.f32 %v2746_v14, %v3599_v41 }
 0x49e   : > { %v1797_v17 = vmul.f32 %v2748_v15, %v3601_v42 }
 0x49f   : > { %1802 = vst.msk [vmem:[%s3628_s9 + $0x18] sm:$0xff] %vm1754_vm3, %v1798_v16  ;;  %v1806_v18 = vpack.c.bf16 %v1798_v16, %v1798_v16 }
 0x4a0   : > { %1801 = vst.msk [vmem:[%s3628_s9 + $0x10] sm:$0xff] %vm1754_vm3, %v1797_v17  ;;  %v1805_v19 = vpack.c.bf16 %v1797_v17, %v1797_v17  ;;  %s2931_s9 = scalar_lea.vmem %s2930_s27, 1024 }
 0x4a1   : > { %2607 = vmatmul.mubr.msk.bf16.vlgmr.msra.gmra.mrb[20].mxu0 %vm1754_vm3, %v1806_v18  ;;  %v2494_v18 = vld [vmem:[%s3888_s22] ss:$0 sm:$0xff]  ;;  %p2933_p10 = scmp.lt.s32.totalorder %s2931_s9, %s2925_s17 }
 0x4a2   : > { %2601 = vmatmul.mubr.msk.bf16.vlgmr.msra.gmra.mrb[16].mxu1 %vm1754_vm3, %v1805_v19 }
 0x4a3   : > { %2614 = vmatprep.mubr.msk.bf16.mxu1 %vm3048_vm0, %v3047_v0  ;;  %2611 = vmatpush3.bf16.msra.mxu1 %v2731_v51  ;;  %p2934_p4 = por %p2933_p10, %p2932_p0 }
 0x4a4   : > { %2612 = vmatprep.subr.bf16.mxu1 %v3047_v0 }
 0x4a5   : > { %p2935_p6 = pnand %p2934_p4, %p2928_p5 }
 0x4a7   : > { %2613 = vmatpush3.bf16.msra.mxu1 %v2732_v1 }
 0x54f   : > { %v1844_v20 = vpop.f32.mrb[12].mxu1  ;;  %v1887_v21 = vpop.f32.mrb[16].mxu0 }
 0x550   : > { %v2590_v22 = vpop.f32.mrb[13].mxu1  ;;  %v2596_v28 = vpop.f32.mrb[17].mxu0 }
 0x551   : > { %v1847_v41 = vpop.f32.mrb[14].mxu1  ;;  %v1890_v29 = vpop.f32.mrb[18].mxu0 }
 0x552   : > { %v2591_v42 = vpop.f32.mrb[15].mxu1  ;;  %v2597_v30 = vpop.f32.mrb[19].mxu0 }
 0x574   : > { %v1973_v31 = vpop.f32.mrb[20].mxu0 }
 0x575   : > { %v1930_v32 = vpop.f32.mrb[16].mxu1  ;;  %v1995_v34 = vcombine.low %v1887_v21, %v1973_v31  ;;  %v1996_v24 = vcombine.high %v1887_v21, %v1973_v31  ;;  %v2608_v25 = vpop.f32.mrb[21].mxu0 }
 0x576   : > { %v1979_v23 = vcombine.low %v1844_v20, %v1930_v32  ;;  %v1980_v26 = vcombine.high %v1844_v20, %v1930_v32  ;;  %v2602_v35 = vpop.f32.mrb[17].mxu1  ;;  %v1976_v37 = vpop.f32.mrb[22].mxu0 }
 0x577   : > { %v2003_v38 = vrot.slane %v1995_v34, %v3492_v45  ;;  %v2010_v39 = vrot.slane %v1996_v24, %v3492_v45  ;;  %v1933_v40 = vpop.f32.mrb[18].mxu1  ;;  %v2609_v43 = vpop.f32.mrb[23].mxu0 }
 0x578   : > { %v1987_v44 = vrot.slane %v1979_v23, %v3492_v45  ;;  %v1994_v46 = vrot.slane %v1980_v26, %v3492_v45  ;;  %v2603_v47 = vpop.f32.mrb[19].mxu1 }
 0x57a   : > { %v2011_v48 = vcombine.low %v1987_v44, %v2003_v38  ;;  %v2012_v49 = vcombine.high %v1987_v44, %v2003_v38  ;;  %v2027_v27 = vcombine.low %v1994_v46, %v2010_v39  ;;  %v2028_v50 = vcombine.high %v1994_v46, %v2010_v39 }
 0x57c   : > { %v2019_v53 = vrot.slane %v2011_v48, %v3494_v52  ;;  %v2026_v54 = vrot.slane %v2012_v49, %v3494_v52  ;;  %v2035_v55 = vrot.slane %v2027_v27, %v3494_v52  ;;  %v2042_v56 = vrot.slane %v2028_v50, %v3494_v52 }
 0x57e   : > { %v2047_v57 = vcombine.low %v2019_v53, %v2026_v54  ;;  %v2492_v58 = vcombine.high %v2019_v53, %v2026_v54  ;;  %v2063_v59 = vcombine.low %v2035_v55, %v2042_v56  ;;  %v2493_v60 = vcombine.high %v2035_v55, %v2042_v56 }
 0x580   : > { %v2054_v61 = vrot.slane %v2047_v57, %v3492_v45  ;;  %v2062_v62 = vrot.slane %v2492_v58, %v3492_v45  ;;  %v2070_v63 = vrot.slane %v2063_v59, %v3492_v45  ;;  %v2078_v36 = vrot.slane %v2493_v60, %v3492_v45 }
 0x582   : > { %v2080_v33 = vcombine.high %v2054_v61, %v2062_v62  ;;  %v2096_v2 = vcombine.high %v2070_v63, %v2078_v36  ;;  %v2079_v3 = vcombine.low %v2054_v61, %v2062_v62  ;;  %v2095_v4 = vcombine.low %v2070_v63, %v2078_v36 }
 0x584   : > { %v2094_v5 = vrot.slane %v2080_v33, %v3494_v52  ;;  %v2110_v0 = vrot.slane %v2096_v2, %v3494_v52  ;;  %v2087_v6 = vrot.slane %v2079_v3, %v3494_v52  ;;  %v2103_v7 = vrot.slane %v2095_v4, %v3494_v52 }
 0x586   : > { %v2113_v9 = vcombine.low %v2094_v5, %v2110_v0  ;;  %v2112_v10 = vcombine.high %v2087_v6, %v2103_v7  ;;  %v2114_v45 = vcombine.high %v2094_v5, %v2110_v0  ;;  %v2111_v11 = vcombine.low %v2087_v6, %v2103_v7 }
 0x588   : > { %2120 = vrot.lane.b32.xlu1 %v2113_v9, %s3054_s21  ;;  %2116 = vrot.lane.b32.xlu0 %v2112_v10, %s3055_s24 }
 0x58c   : > { %2124 = vrot.lane.b32.xlu1 %v2114_v45, %s3056_s4 }
 0x5fa   : > { %v2121_v12 = vpop.permute.xlu1 %2120  ;;  %v2117_v13 = vpop.permute.xlu0 %2116 }
 0x5fb   : > { %v2127_v14 = vsel %vm1565_vm2, %v2111_v11, %v2117_v13 }
 0x5fc   : > { %v2128_v16 = vsel %vm1754_vm3, %v2127_v14, %v2121_v12 }
 0x5fe   : > { %v2125_v15 = vpop.permute.xlu1 %2124 }
 0x5ff   : > { %v2130_v52 = vsel %vm2129_vm4, %v2128_v16, %v2125_v15 }
 0x600   : > { %v2131_v17 = vpack.c.bf16 %v2130_v52, %v2130_v52 }
 0x602   : > { %2615 = vmatmul.mubr.msk.bf16.vlgmr.msra.gmra.mrb[20].mxu1 %vm643_vm1, %v2131_v17 }
 0x6d5   : > { %v2192_v19 = vpop.f32.mrb[20].mxu1 }
 0x6d6   : > { %v2193_v20 = vadd.f32 %v2494_v18, %v2192_v19  ;;  %v2616_v21 = vpop.f32.mrb[21].mxu1 }
 0x6d7   : > { %v2195_v22 = vpop.f32.mrb[22].mxu1 }
 0x6d8   : > { %v2617_v28 = vpop.f32.mrb[23].mxu1  ;;  %v2198_v41 = vadd.f32 %v2193_v20, %v3444_v8 }
 0x6da   : > { %v2199_v29 = vsel %vm643_vm1, %v2198_v41, 0.0 }
 0x6db   : > { %2200 = vadd.xlane.f32.xlu0 %v2199_v29 }
 0x768   : > { %v2201_v42 = vpop.xlane.xlu0 %2200 }
 0x769   : > { %v2203_v30 = vmul.f32 0.03125, %v2201_v42 }
 0x76b   : > { %v2204_v31 = vsub.f32 %v2198_v41, %v2203_v30 }
 0x76d   : > { %v2205_v32 = vmul.f32 %v2204_v31, %v2204_v31 }
 0x76f   : > { %v2206_v34 = vsel %vm643_vm1, %v2205_v32, 0.0 }
 0x770   : > { %2207 = vadd.xlane.f32.xlu1 %v2206_v34 }
 0x771   : > { %2938 = shalt.err (!%p2935_p6)
}
 0x772   : > { %s2939_s29 = scalar_lea.hbm %s3708_s19, 512  ;;  %s2943_s4 = scalar_lea.hbm %s3890_s20, 1024 }
 0x773   : > { %p2940_p8 = scmp.ne.s32.totalorder %s3708_s19, %s2939_s29  ;;  %p2944_p11 = scmp.lt.u32.totalorder %s3708_s19, %s3890_s20 }
 0x774   : > { %p2945_p13 = scmp.lt.u32.totalorder %s2943_s4, %s2939_s29  ;;  %p2947_p7 = scmp.lt.u32.totalorder %s2939_s29, %s3708_s19 }
 0x775   : > { %p2941_p1 = pnand %p2940_p8, %p3891_p12 }
 0x776   : > { %p2946_p3 = por %p2945_p13, %p2944_p11 }
 0x777   : > { %p2942_p9 = pneg %p2941_p1 }
 0x778   : > { %p2948_p2 = por %p2947_p7, %p2946_p3 }
 0x77a   : > { %p2949_p5 = pnand %p2948_p2, %p2942_p9 }
 0x77c   : > { %2952 = shalt.err (!%p2949_p5)
}
 0x77d   : > { %s3058_s22 = smov 128   ;;  %s3892_s10 = sld [smem:[#allocation36_spill]] }
 0x77e   : > { %2637 = dma.vmem_to_hbm [thread:$0]  (%p3891_p12), %s3710_s23, 512, %s3708_s19, %s2236_s3, %s3058_s22, %s3058_s22, %s3055_s24  }
 0x77f   : > { %s3893_s27 = sld [smem:[#allocation37_spill]]  ;;  %s2502_s9 = sshll.u32 %s3879_s1, 7 }
 0x780   : > { %s605_s29 = scalar_lea.vmem [#allocation13], %s2454_s26  ;;  %s3894_s3 = sld [smem:[#allocation38_spill]] }
 0x781   : > { %s2249_s24 = sshll.u32 %s605_s29, 4  ;;  %s2231_s21 = scalar_lea.sflag [#allocation4], %s3402_s12  ;;  %s3751_s24 = int_to_ptr.vmem [resolvable:$true] %s2249_s24 }
 0x782   : > { %s2953_s4 = scalar_lea.vmem %s3751_s24, 128  ;;  %s3059_s26 = smov [#allocation13]  }
 0x783   : > { %v2498_v26 = vld [vmem:[%s3892_s10] ss:$0 sm:$0xff]  ;;  %p2954_p0 = scmp.ne.s32.totalorder %s3751_s24, %s2953_s4  ;;  %s2957_s1 = sshll.u32 %s3059_s26, 4  ;;  %s2958_s1 = int_to_ptr.vmem [resolvable:$false] %s2957_s1 }
 0x784   : > { %s2959_s28 = scalar_lea.vmem %s2958_s1, 256  ;;  %p2960_p6 = scmp.lt.s32.totalorder %s3751_s24, %s2958_s1 }
 0x785   : > { %v2499_v37 = vld [vmem:[%s3893_s27] ss:$0 sm:$0xff]  ;;  %p2955_p10 = pnand %p2954_p0, %p3891_p12  ;;  %p2961_p8 = scmp.lt.s32.totalorder %s2959_s28, %s2953_s4 }
 0x786   : > { %s3749_s14 = scalar_lea.hbm %s3894_s3, %s2502_s9 }
 0x787   : > { %p2956_p4 = pneg %p2955_p10  ;;  %p2962_p1 = por %p2961_p8, %p2960_p6 }
 0x789   : > { %p2963_p9 = pnand %p2962_p1, %p2956_p4 }
 0x7fd   : > { %v2208_v8 = vpop.xlane.xlu1 %2207 }
 0x7fe   : > { %v2209_v24 = vmul.f32 0.03125, %v2208_v8 }
 0x800   : > { %v2210_v25 = vadd.f32 1e-05, %v2209_v24 }
 0x802   : > { %2749 = vrsqrt.f32 %v2210_v25 }
 0x80c   : > { %v2750_v23 = vpop.eup %2749 }
 0x80d   : > { %v2212_v35 = vmul.f32 %v2750_v23, %v2204_v31 }
 0x80f   : > { %v2220_v38 = vmul.f32 %v2498_v26, %v2212_v35 }
 0x811   : > { %v2228_v39 = vadd.f32 %v2499_v37, %v2220_v38 }
 0x813   : > { %2229 = vst.msk [vmem:[%s605_s29] sm:$0xff] %vm643_vm1, %v2228_v39 }
 0x814   : > { %2966 = shalt.err (!%p2963_p9)
}
 0x815   : > { %s2967_s12 = scalar_lea.hbm %s3749_s14, 128  ;;  %s2971_s18 = scalar_lea.hbm %s3894_s3, 256 }
 0x816   : > { %p2968_p11 = scmp.ne.s32.totalorder %s3749_s14, %s2967_s12  ;;  %p2972_p7 = scmp.lt.u32.totalorder %s3749_s14, %s3894_s3 }
 0x817   : > { %p2973_p2 = scmp.lt.u32.totalorder %s2971_s18, %s2967_s12  ;;  %p2975_p0 = scmp.lt.u32.totalorder %s2967_s12, %s3749_s14 }
 0x818   : > { %p2969_p13 = pnand %p2968_p11, %p3891_p12 }
 0x819   : > { %p2974_p5 = por %p2973_p2, %p2972_p7 }
 0x81a   : > { %p2970_p3 = pneg %p2969_p13 }
 0x81b   : > { %p2976_p10 = por %p2975_p0, %p2974_p5 }
 0x81d   : > { %p2977_p4 = pnand %p2976_p10, %p2970_p3 }
 0x81f   : > { %2980 = shalt.err (!%p2977_p4)
}
 0x820   : > { %2636 = dma.vmem_to_hbm [thread:$0]  (%p3891_p12), %s3751_s24, 128, %s3749_s14, %s2231_s21  }
 0x821 PF: > { %s3895_s17 = sld [smem:[#allocation22_spill]]  ;;  %s3896_s15 = sld [smem:[#allocation28_spill]] }
 0x822   : > { %p3898_p8 = scmp.ge.s32.totalorder %s3035_s16, 2 }
 0x827   : > { %s2277_s27 = sand.u32 1, %s3895_s17   ;;  %p3897_p6 = scmp.ne.s32.totalorder %s3896_s15, 0 }
 0x828   : > { %s2278_s9 = scalar_lea.sflag [#allocation4], %s2277_s27 }
 0x829   : > { %p2661_p1 = pnand %p3898_p8, %p3897_p6 }
 0x82b   : > { %3014 = dma.done.wait (!%p2661_p1), %s2278_s9, 128  }
 0x82c   : > { %3016 = vsyncadd (!%p2661_p1), %s2278_s9, 4294967168  ;;  %s2287_s29 = scalar_lea.sflag [#allocation15], %s2277_s27 }
 0x82d   : > { %3018 = dma.done.wait (!%p2661_p1), %s2287_s29, 512  }
 0x82e   : > { %3020 = vsyncadd (!%p2661_p1), %s2287_s29, 4294966784  ;;  %s3899_s16 = sld [smem:[#allocation25_spill]]  ;;  %s3900_s25 = sld [smem:[#allocation23_spill]] }
 0x82f   : > { %s3901_s15 = sld [smem:[#allocation26_spill]]  ;;  %s3902_s29 = smov %s3027_s30 }
 0x834   : > { %p36_p12 = scmp.ge.s32.totalorder %s3899_s16, 4   ;;  %s3903_s30 = smov %s3900_s25 }
 0x836   :  { %38 = sbr.rel (!%p36_p12) target bundleno = 23 (0x17), region = 170 }
 0x83d   :  { %2292 = vsyncpa [#allocation3], 1 }
 0x83e   :  { %2294 = vsyncpa [#allocation3 + $0x1], 1 }
 0x83f   :  { %2295 = vsyncpa [#allocation6], 1 }
 0x840   :  { %2297 = vsyncpa [#allocation6 + $0x1], 1 }
 0x841   :  { %2298 = vsyncpa [#allocation9], 1 }
 0x842   :  { %2299 = vsyncpa [#allocation12], 1 }
 0x843   :  { %2300 = vsyncpa [#allocation4], 1 }
 0x844   :  { %2302 = vsyncpa [#allocation4 + $0x1], 1 }
 0x845   :  { %2303 = vsyncpa [#allocation15], 1 }
 0x846   :  { %2305 = vsyncpa [#allocation15 + $0x1], 1 }

</bundles_post_ra>
